<compile_context>
chip_gen: v6e
topology: v6e:2x2x1
jax: 0.10.0
libtpu: 0.0.40
codegen_flags: <defaults>
</compile_context>

<pallas_src>
import jax
import jax.numpy as jnp
from jax.experimental import pallas as pl
from jax.experimental.pallas import tpu as pltpu

NC_PAD = 128          # lane-dense padded class dimension
NEG_PAD = -1e30       # bias value for padded classes (never wins argmax)

_SINGLE_BUFFER_OK = None   # lazily probed: does this build accept pl.Buffered(1)?


def _round_up(x, m):
    return (x + m - 1) // m * m


def _choose_tile(batch):
    """Batch tile: multiple of 16 rows, <=1024, and for large batches keep
    >=4 grid steps so the 'parallel' axis can feed both v7x TensorCores."""
    target = pl.cdiv(batch, 4)
    return int(max(16, min(1024, _round_up(target, 16))))


# ----------------------------- kernels --------------------------------------

def _mlp_body(x_ref, w1_ref, b1_ref, w2_ref, b2_ref, w3_ref, b3_ref):
    # Cast after the DMA; this is a no-op when x already arrives as bf16.
    x = x_ref[...].astype(jnp.bfloat16)

    # Layer 1: (TB, in) @ (in, 256) -> f32 acc -> +b -> ReLU
    h1 = jnp.dot(x, w1_ref[...], preferred_element_type=jnp.float32) + b1_ref[...]
    h1 = jnp.maximum(h1, 0.0).astype(jnp.bfloat16)

    # Layer 2: (TB, 256) @ (256, 64)
    h2 = jnp.dot(h1, w2_ref[...], preferred_element_type=jnp.float32) + b2_ref[...]
    h2 = jnp.maximum(h2, 0.0).astype(jnp.bfloat16)

    # Layer 3: (TB, 64) @ (64, 128)   (classes padded to 128 lanes, pad bias -1e30)
    return jnp.dot(h2, w3_ref[...], preferred_element_type=jnp.float32) + b3_ref[...]


def _mlp_logits_kernel(x_ref, w1_ref, b1_ref, w2_ref, b2_ref, w3_ref, b3_ref,
                       o_ref):
    logits = _mlp_body(x_ref, w1_ref, b1_ref, w2_ref, b2_ref, w3_ref, b3_ref)
    o_ref[...] = logits.astype(o_ref.dtype)


def _mlp_argmax_kernel(x_ref, w1_ref, b1_ref, w2_ref, b2_ref, w3_ref, b3_ref,
                       o_ref):
    logits = _mlp_body(x_ref, w1_ref, b1_ref, w2_ref, b2_ref, w3_ref, b3_ref)
    # First-index argmax over the 128 padded lanes (XLU reduces; free slack
    # in a mem-bound kernel).  Padded columns are -1e30 so they never win.
    row_max = jnp.max(logits, axis=-1, keepdims=True)
    lane = jax.lax.broadcasted_iota(jnp.int32, logits.shape, dimension=1)
    first_hit = jnp.min(jnp.where(logits == row_max, lane, NC_PAD),
                        axis=-1, keepdims=True)
    o_ref[...] = first_hit.astype(jnp.int32)


# ----------------------------- host-side wrappers ----------------------------

def prepare_params(params):
    """One-time host-side conversion: bf16 weights, f32 biases, last layer
    zero-padded to 128 output lanes with a -1e30 bias pad (argmax-safe)."""
    w1, b1, w2, b2, w3, b3 = params
    num_classes = w3.shape[1]
    assert 0 < num_classes <= NC_PAD, (
        f"num_classes={num_classes} must be in (0, {NC_PAD}]")
    pad = NC_PAD - num_classes
    w3p = jnp.pad(w3, ((0, 0), (0, pad)))
    b3p = jnp.pad(b3, ((0, 0), (0, pad)), constant_values=NEG_PAD)
    return (w1.astype(jnp.bfloat16), b1.astype(jnp.float32),
            w2.astype(jnp.bfloat16), b2.astype(jnp.float32),
            w3p.astype(jnp.bfloat16), b3p.astype(jnp.float32)), num_classes


def _pallas_forward(x2d, weights, training):
    global _SINGLE_BUFFER_OK
    w1, b1, w2, b2, w3p, b3p = weights
    batch, in_size = x2d.shape
    tb = _choose_tile(batch)
    grid = (pl.cdiv(batch, tb),)           # ragged last tile handled by Pallas

    def build(single_buffer):
        def resident(shape):
            # Constant block index => the block stays VMEM-resident across the
            # whole grid; with Buffered(1) the dead second buffer is dropped.
            if single_buffer:
                return pl.BlockSpec(shape, lambda i: (0, 0),
                                    pipeline_mode=pl.Buffered(1))
            return pl.BlockSpec(shape, lambda i: (0, 0))

        in_specs = [pl.BlockSpec((tb, in_size), lambda i: (i, 0))] + [
            resident(a.shape) for a in (w1, b1, w2, b2, w3p, b3p)]

        if training:
            kernel = _mlp_logits_kernel
            out_shape = jax.ShapeDtypeStruct((batch, NC_PAD), jnp.float32)
            out_specs = pl.BlockSpec((tb, NC_PAD), lambda i: (i, 0))
        else:
            kernel = _mlp_argmax_kernel
            out_shape = jax.ShapeDtypeStruct((batch, 1), jnp.int32)
            out_specs = pl.BlockSpec((tb, 1), lambda i: (i, 0))

        return pl.pallas_call(
            kernel,
            out_shape=out_shape,
            grid=grid,
            in_specs=in_specs,
            out_specs=out_specs,
            compiler_params=pltpu.CompilerParams(
                dimension_semantics=("parallel",),
                vmem_limit_bytes=32 << 20,
            ),
        )

    args = (x2d, w1, b1, w2, b2, w3p, b3p)
    if _SINGLE_BUFFER_OK is None:
        try:
            out = build(True)(*args)
            _SINGLE_BUFFER_OK = True
            return out
        except Exception:
            # This JAX build rejects Buffered(1); fall back to default buffering.
            _SINGLE_BUFFER_OK = False
    return build(_SINGLE_BUFFER_OK)(*args)


def baseline_forward(x, prep_params, num_classes, training=False):
    """Forward pass of Baseline.
    Returns logits (batch, num_classes) if training else int32 argmax (batch,).
    Data contract: x should arrive in HBM as bf16 (produced upstream) for the
    fast path; f32 x also works (cast inside the kernel after the DMA)."""
    w1 = prep_params[0]
    in_size = w1.shape[0]
    x2d = x.reshape(-1, in_size)            # same as torch: x.view(-1, in_size)
    out = _pallas_forward(x2d, prep_params, training)
    if training:
        return out[:, :num_classes]
    return out[:, 0]


# ----------------------------- init & references -----------------------------

def init_params(key, in_size, num_classes):
    """Deterministic init mimicking PyTorch nn.Linear default
    (U[-1/sqrt(fan_in), +1/sqrt(fan_in)]). Weights stored as (in, out)."""
    def linear(key, fan_in, fan_out):
        kw, kb = jax.random.split(key)
        bound = 1.0 / jnp.sqrt(fan_in)
        w = jax.random.uniform(kw, (fan_in, fan_out), jnp.float32, -bound, bound)
        b = jax.random.uniform(kb, (1, fan_out), jnp.float32, -bound, bound)
        return w, b

    k1, k2, k3 = jax.random.split(key, 3)
    w1, b1 = linear(k1, in_size, 256)
    w2, b2 = linear(k2, 256, 64)
    w3, b3 = linear(k3, 64, num_classes)
    return (w1, b1, w2, b2, w3, b3)


def _ref_forward_f32(xf, params):
    w1, b1, w2, b2, w3, b3 = params
    h = jnp.maximum(xf @ w1 + b1, 0.0)
    h = jnp.maximum(h @ w2 + b2, 0.0)
    return h @ w3 + b3


def _ref_forward_bf16(xf, params):
    """Reference mimicking the kernel's bf16-input / f32-accumulate path."""
    w1, b1, w2, b2, w3, b3 = params
    bf = jnp.bfloat16
    h = jnp.dot(xf.astype(bf), w1.astype(bf), preferred_element_type=jnp.float32) + b1
    h = jnp.maximum(h, 0.0)
    h = jnp.dot(h.astype(bf), w2.astype(bf), preferred_element_type=jnp.float32) + b2
    h = jnp.maximum(h, 0.0)
    return jnp.dot(h.astype(bf), w3.astype(bf), preferred_element_type=jnp.float32) + b3


if __name__ == "__main__":
    key = jax.random.PRNGKey(0)
    kx, kp = jax.random.split(key)

    # Shapes consistent with the module: input_shape=(4,16,16) -> in_size=1024
    batch, C, H, W = 2, 4, 16, 16
    num_classes = 10
    in_size = C * H * W

    x = jax.random.normal(kx, (batch, C, H, W), jnp.float32)
    params = init_params(kp, in_size, num_classes)
    prep, nc = prepare_params(params)

    # New data contract (perf review): x arrives in HBM as bf16 — the cast is
    # done by the upstream producer, not by the kernel wrapper.
    x_bf16 = x.astype(jnp.bfloat16)

    # Training-mode output (logits) and eval-mode output (in-kernel argmax).
    logits = jax.block_until_ready(baseline_forward(x_bf16, prep, nc, training=True))
    preds = jax.block_until_ready(baseline_forward(x_bf16, prep, nc, training=False))

    # Cross-check against references (same bf16 x the kernel sees).
    xf = x_bf16.reshape(-1, in_size)
    ref_bf16 = _ref_forward_bf16(xf, params)
    ref_f32 = _ref_forward_f32(xf.astype(jnp.float32), params)

    assert logits.shape == (batch, num_classes)
    assert preds.shape == (batch,)
    assert jnp.allclose(logits, ref_bf16, atol=5e-3, rtol=5e-3)
    assert jnp.allclose(logits, ref_f32, atol=5e-2, rtol=5e-2)
    assert jnp.array_equal(preds, jnp.argmax(ref_bf16, axis=-1))

    # Multi-step grid with a ragged final tile (batch=70 -> tb=32, grid=3).
    xb = jax.random.normal(jax.random.PRNGKey(1), (70, in_size),
                           jnp.float32).astype(jnp.bfloat16)
    logits_b = jax.block_until_ready(baseline_forward(xb, prep, nc, training=True))
    preds_b = jax.block_until_ready(baseline_forward(xb, prep, nc, training=False))
    ref_b = _ref_forward_bf16(xb, params)
    assert logits_b.shape == (70, num_classes)
    assert preds_b.shape == (70,)
    assert jnp.allclose(logits_b, ref_b, atol=5e-3, rtol=5e-3)
    # In-kernel argmax must agree with argmax over the kernel's own logits.
    assert jnp.array_equal(preds_b, jnp.argmax(logits_b, axis=-1))

    print("KERNEL_OK")
</pallas_src>

<mosaic_0001>
module attributes {stable_mosaic.version = 11 : i64} {
  func.func @_mlp_logits_kernel(%arg0: i32, %arg1: memref<16x1024xbf16, #tpu.memory_space<vmem>>, %arg2: memref<1024x256xbf16, #tpu.memory_space<vmem>>, %arg3: memref<1x256xf32, #tpu.memory_space<vmem>>, %arg4: memref<256x64xbf16, #tpu.memory_space<vmem>>, %arg5: memref<1x64xf32, #tpu.memory_space<vmem>>, %arg6: memref<64x128xbf16, #tpu.memory_space<vmem>>, %arg7: memref<1x128xf32, #tpu.memory_space<vmem>>, %arg8: memref<16x128xf32, #tpu.memory_space<vmem>>) attributes {dimension_semantics = [#tpu.dimension_semantics<parallel>], iteration_bounds = array<i64: 1>, scalar_prefetch = 0 : i64, scratch_operands = 0 : i64, tpu.core_type = #tpu.core_type<tc>, window_params = [{transform_indices = @transform_0, window_bounds = array<i64: 16, 1024>}, {pipeline_mode = #tpu.pipeline_mode<synchronous>, transform_indices = @transform_1, window_bounds = array<i64: 1024, 256>}, {pipeline_mode = #tpu.pipeline_mode<synchronous>, transform_indices = @transform_2, window_bounds = array<i64: 1, 256>}, {pipeline_mode = #tpu.pipeline_mode<synchronous>, transform_indices = @transform_3, window_bounds = array<i64: 256, 64>}, {pipeline_mode = #tpu.pipeline_mode<synchronous>, transform_indices = @transform_4, window_bounds = array<i64: 1, 64>}, {pipeline_mode = #tpu.pipeline_mode<synchronous>, transform_indices = @transform_5, window_bounds = array<i64: 64, 128>}, {pipeline_mode = #tpu.pipeline_mode<synchronous>, transform_indices = @transform_6, window_bounds = array<i64: 1, 128>}, {transform_indices = @transform_7, window_bounds = array<i64: 16, 128>}]} {
    %c0 = arith.constant 0 : index
    %c0_0 = arith.constant 0 : index
    %0 = vector.load %arg1[%c0, %c0_0] : memref<16x1024xbf16, #tpu.memory_space<vmem>>, vector<16x1024xbf16>
    %c0_1 = arith.constant 0 : index
    %c0_2 = arith.constant 0 : index
    %1 = vector.load %arg2[%c0_1, %c0_2] : memref<1024x256xbf16, #tpu.memory_space<vmem>>, vector<1024x256xbf16>
    %cst = arith.constant dense<0.000000e+00> : vector<16x256xf32>
    %2 = tpu.matmul %0, %1, %cst {dimension_numbers = #tpu.dot_dimension_numbers<[1], [0], [0], [1], [0, 0, 1, 1], [], []>} : vector<16x1024xbf16>, vector<1024x256xbf16>, vector<16x256xf32> -> vector<16x256xf32>
    %c0_3 = arith.constant 0 : index
    %c0_4 = arith.constant 0 : index
    %3 = vector.load %arg3[%c0_3, %c0_4] : memref<1x256xf32, #tpu.memory_space<vmem>>, vector<1x256xf32>
    %4 = vector.broadcast %3 : vector<1x256xf32> to vector<16x256xf32>
    %5 = arith.addf %2, %4 : vector<16x256xf32>
    %cst_5 = arith.constant 0.000000e+00 : f32
    %6 = vector.broadcast %cst_5 : f32 to vector<16x256xf32>
    %7 = arith.maximumf %5, %6 : vector<16x256xf32>
    %8 = arith.truncf %7 : vector<16x256xf32> to vector<16x256xbf16>
    %c0_6 = arith.constant 0 : index
    %c0_7 = arith.constant 0 : index
    %9 = vector.load %arg4[%c0_6, %c0_7] : memref<256x64xbf16, #tpu.memory_space<vmem>>, vector<256x64xbf16>
    %cst_8 = arith.constant dense<0.000000e+00> : vector<16x64xf32>
    %10 = tpu.matmul %8, %9, %cst_8 {dimension_numbers = #tpu.dot_dimension_numbers<[1], [0], [0], [1], [0, 0, 1, 1], [], []>} : vector<16x256xbf16>, vector<256x64xbf16>, vector<16x64xf32> -> vector<16x64xf32>
    %c0_9 = arith.constant 0 : index
    %c0_10 = arith.constant 0 : index
    %11 = vector.load %arg5[%c0_9, %c0_10] : memref<1x64xf32, #tpu.memory_space<vmem>>, vector<1x64xf32>
    %12 = vector.broadcast %11 : vector<1x64xf32> to vector<16x64xf32>
    %13 = arith.addf %10, %12 : vector<16x64xf32>
    %cst_11 = arith.constant 0.000000e+00 : f32
    %14 = vector.broadcast %cst_11 : f32 to vector<16x64xf32>
    %15 = arith.maximumf %13, %14 : vector<16x64xf32>
    %16 = arith.truncf %15 : vector<16x64xf32> to vector<16x64xbf16>
    %c0_12 = arith.constant 0 : index
    %c0_13 = arith.constant 0 : index
    %17 = vector.load %arg6[%c0_12, %c0_13] : memref<64x128xbf16, #tpu.memory_space<vmem>>, vector<64x128xbf16>
    %cst_14 = arith.constant dense<0.000000e+00> : vector<16x128xf32>
    %18 = tpu.matmul %16, %17, %cst_14 {dimension_numbers = #tpu.dot_dimension_numbers<[1], [0], [0], [1], [0, 0, 1, 1], [], []>} : vector<16x64xbf16>, vector<64x128xbf16>, vector<16x128xf32> -> vector<16x128xf32>
    %c0_15 = arith.constant 0 : index
    %c0_16 = arith.constant 0 : index
    %19 = vector.load %arg7[%c0_15, %c0_16] : memref<1x128xf32, #tpu.memory_space<vmem>>, vector<1x128xf32>
    %20 = vector.broadcast %19 : vector<1x128xf32> to vector<16x128xf32>
    %21 = arith.addf %18, %20 : vector<16x128xf32>
    %c0_17 = arith.constant 0 : index
    %c0_18 = arith.constant 0 : index
    %22 = vector.load %arg8[%c0_17, %c0_18] : memref<16x128xf32, #tpu.memory_space<vmem>>, vector<16x128xf32>
    tpu.vector_store %arg8[%c0_17, %c0_18], %21 {strides = array<i32>} : memref<16x128xf32, #tpu.memory_space<vmem>>, vector<16x128xf32>,
    return
  }
  func.func @transform_0(%arg0: i32) -> (i32, i32) {
    %c0_i32 = arith.constant 0 : i32
    %c0_i32_0 = arith.constant 0 : i32
    return %arg0, %c0_i32 : i32, i32
  }
  func.func @transform_1(%arg0: i32) -> (i32, i32) {
    %c0_i32 = arith.constant 0 : i32
    %c0_i32_0 = arith.constant 0 : i32
    %c0_i32_1 = arith.constant 0 : i32
    return %c0_i32, %c0_i32_0 : i32, i32
  }
  func.func @transform_2(%arg0: i32) -> (i32, i32) {
    %c0_i32 = arith.constant 0 : i32
    %c0_i32_0 = arith.constant 0 : i32
    %c0_i32_1 = arith.constant 0 : i32
    return %c0_i32, %c0_i32_0 : i32, i32
  }
  func.func @transform_3(%arg0: i32) -> (i32, i32) {
    %c0_i32 = arith.constant 0 : i32
    %c0_i32_0 = arith.constant 0 : i32
    %c0_i32_1 = arith.constant 0 : i32
    return %c0_i32, %c0_i32_0 : i32, i32
  }
  func.func @transform_4(%arg0: i32) -> (i32, i32) {
    %c0_i32 = arith.constant 0 : i32
    %c0_i32_0 = arith.constant 0 : i32
    %c0_i32_1 = arith.constant 0 : i32
    return %c0_i32, %c0_i32_0 : i32, i32
  }
  func.func @transform_5(%arg0: i32) -> (i32, i32) {
    %c0_i32 = arith.constant 0 : i32
    %c0_i32_0 = arith.constant 0 : i32
    %c0_i32_1 = arith.constant 0 : i32
    return %c0_i32, %c0_i32_0 : i32, i32
  }
  func.func @transform_6(%arg0: i32) -> (i32, i32) {
    %c0_i32 = arith.constant 0 : i32
    %c0_i32_0 = arith.constant 0 : i32
    %c0_i32_1 = arith.constant 0 : i32
    return %c0_i32, %c0_i32_0 : i32, i32
  }
  func.func @transform_7(%arg0: i32) -> (i32, i32) {
    %c0_i32 = arith.constant 0 : i32
    %c0_i32_0 = arith.constant 0 : i32
    return %arg0, %c0_i32 : i32, i32
  }
}

module attributes {stable_mosaic.version = 11 : i64} {
  func.func @_mlp_logits_kernel(%arg0: i32, %arg1: memref<16x1024xbf16, #tpu.memory_space<vmem>>, %arg2: memref<1024x256xbf16, #tpu.memory_space<vmem>>, %arg3: memref<1x256xf32, #tpu.memory_space<vmem>>, %arg4: memref<256x64xbf16, #tpu.memory_space<vmem>>, %arg5: memref<1x64xf32, #tpu.memory_space<vmem>>, %arg6: memref<64x128xbf16, #tpu.memory_space<vmem>>, %arg7: memref<1x128xf32, #tpu.memory_space<vmem>>, %arg8: memref<16x128xf32, #tpu.memory_space<vmem>>) attributes {dimension_semantics = [#tpu.dimension_semantics<parallel>], iteration_bounds = array<i64: 1>, scalar_prefetch = 0 : i64, scratch_operands = 0 : i64, tpu.core_type = #tpu.core_type<tc>, window_params = [{transform_indices = @transform_0, window_bounds = array<i64: 16, 1024>}, {pipeline_mode = #tpu.pipeline_mode<synchronous>, transform_indices = @transform_1, window_bounds = array<i64: 1024, 256>}, {pipeline_mode = #tpu.pipeline_mode<synchronous>, transform_indices = @transform_2, window_bounds = array<i64: 1, 256>}, {pipeline_mode = #tpu.pipeline_mode<synchronous>, transform_indices = @transform_3, window_bounds = array<i64: 256, 64>}, {pipeline_mode = #tpu.pipeline_mode<synchronous>, transform_indices = @transform_4, window_bounds = array<i64: 1, 64>}, {pipeline_mode = #tpu.pipeline_mode<synchronous>, transform_indices = @transform_5, window_bounds = array<i64: 64, 128>}, {pipeline_mode = #tpu.pipeline_mode<synchronous>, transform_indices = @transform_6, window_bounds = array<i64: 1, 128>}, {transform_indices = @transform_7, window_bounds = array<i64: 16, 128>}]} {
    %c0 = arith.constant 0 : index
    %c0_0 = arith.constant 0 : index
    %0 = vector.load %arg1[%c0, %c0_0] : memref<16x1024xbf16, #tpu.memory_space<vmem>>, vector<16x1024xbf16>
    %c0_1 = arith.constant 0 : index
    %c0_2 = arith.constant 0 : index
    %1 = vector.load %arg2[%c0_1, %c0_2] : memref<1024x256xbf16, #tpu.memory_space<vmem>>, vector<1024x256xbf16>
    %cst = arith.constant dense<0.000000e+00> : vector<16x256xf32>
    %2 = tpu.matmul %0, %1, %cst {dimension_numbers = #tpu.dot_dimension_numbers<[1], [0], [0], [1], [0, 0, 1, 1], [], []>} : vector<16x1024xbf16>, vector<1024x256xbf16>, vector<16x256xf32> -> vector<16x256xf32>
    %c0_3 = arith.constant 0 : index
    %c0_4 = arith.constant 0 : index
    %3 = vector.load %arg3[%c0_3, %c0_4] : memref<1x256xf32, #tpu.memory_space<vmem>>, vector<1x256xf32>
    %4 = vector.broadcast %3 : vector<1x256xf32> to vector<16x256xf32>
    %5 = arith.addf %2, %4 : vector<16x256xf32>
    %cst_5 = arith.constant 0.000000e+00 : f32
    %6 = vector.broadcast %cst_5 : f32 to vector<16x256xf32>
    %7 = arith.maximumf %5, %6 : vector<16x256xf32>
    %8 = arith.truncf %7 : vector<16x256xf32> to vector<16x256xbf16>
    %c0_6 = arith.constant 0 : index
    %c0_7 = arith.constant 0 : index
    %9 = vector.load %arg4[%c0_6, %c0_7] : memref<256x64xbf16, #tpu.memory_space<vmem>>, vector<256x64xbf16>
    %cst_8 = arith.constant dense<0.000000e+00> : vector<16x64xf32>
    %10 = tpu.matmul %8, %9, %cst_8 {dimension_numbers = #tpu.dot_dimension_numbers<[1], [0], [0], [1], [0, 0, 1, 1], [], []>} : vector<16x256xbf16>, vector<256x64xbf16>, vector<16x64xf32> -> vector<16x64xf32>
    %c0_9 = arith.constant 0 : index
    %c0_10 = arith.constant 0 : index
    %11 = vector.load %arg5[%c0_9, %c0_10] : memref<1x64xf32, #tpu.memory_space<vmem>>, vector<1x64xf32>
    %12 = vector.broadcast %11 : vector<1x64xf32> to vector<16x64xf32>
    %13 = arith.addf %10, %12 : vector<16x64xf32>
    %cst_11 = arith.constant 0.000000e+00 : f32
    %14 = vector.broadcast %cst_11 : f32 to vector<16x64xf32>
    %15 = arith.maximumf %13, %14 : vector<16x64xf32>
    %16 = arith.truncf %15 : vector<16x64xf32> to vector<16x64xbf16>
    %c0_12 = arith.constant 0 : index
    %c0_13 = arith.constant 0 : index
    %17 = vector.load %arg6[%c0_12, %c0_13] : memref<64x128xbf16, #tpu.memory_space<vmem>>, vector<64x128xbf16>
    %cst_14 = arith.constant dense<0.000000e+00> : vector<16x128xf32>
    %18 = tpu.matmul %16, %17, %cst_14 {dimension_numbers = #tpu.dot_dimension_numbers<[1], [0], [0], [1], [0, 0, 1, 1], [], []>} : vector<16x64xbf16>, vector<64x128xbf16>, vector<16x128xf32> -> vector<16x128xf32>
    %c0_15 = arith.constant 0 : index
    %c0_16 = arith.constant 0 : index
    %19 = vector.load %arg7[%c0_15, %c0_16] : memref<1x128xf32, #tpu.memory_space<vmem>>, vector<1x128xf32>
    %20 = vector.broadcast %19 : vector<1x128xf32> to vector<16x128xf32>
    %21 = arith.addf %18, %20 : vector<16x128xf32>
    %c0_17 = arith.constant 0 : index
    %c0_18 = arith.constant 0 : index
    %22 = vector.load %arg8[%c0_17, %c0_18] : memref<16x128xf32, #tpu.memory_space<vmem>>, vector<16x128xf32>
    tpu.vector_store %arg8[%c0_17, %c0_18], %21 {strides = array<i32>} : memref<16x128xf32, #tpu.memory_space<vmem>>, vector<16x128xf32>,
    return
  }
  func.func @transform_0(%arg0: i32) -> (i32, i32) {
    %c0_i32 = arith.constant 0 : i32
    %c0_i32_0 = arith.constant 0 : i32
    return %arg0, %c0_i32 : i32, i32
  }
  func.func @transform_1(%arg0: i32) -> (i32, i32) {
    %c0_i32 = arith.constant 0 : i32
    %c0_i32_0 = arith.constant 0 : i32
    %c0_i32_1 = arith.constant 0 : i32
    return %c0_i32, %c0_i32_0 : i32, i32
  }
  func.func @transform_2(%arg0: i32) -> (i32, i32) {
    %c0_i32 = arith.constant 0 : i32
    %c0_i32_0 = arith.constant 0 : i32
    %c0_i32_1 = arith.constant 0 : i32
    return %c0_i32, %c0_i32_0 : i32, i32
  }
  func.func @transform_3(%arg0: i32) -> (i32, i32) {
    %c0_i32 = arith.constant 0 : i32
    %c0_i32_0 = arith.constant 0 : i32
    %c0_i32_1 = arith.constant 0 : i32
    return %c0_i32, %c0_i32_0 : i32, i32
  }
  func.func @transform_4(%arg0: i32) -> (i32, i32) {
    %c0_i32 = arith.constant 0 : i32
    %c0_i32_0 = arith.constant 0 : i32
    %c0_i32_1 = arith.constant 0 : i32
    return %c0_i32, %c0_i32_0 : i32, i32
  }
  func.func @transform_5(%arg0: i32) -> (i32, i32) {
    %c0_i32 = arith.constant 0 : i32
    %c0_i32_0 = arith.constant 0 : i32
    %c0_i32_1 = arith.constant 0 : i32
    return %c0_i32, %c0_i32_0 : i32, i32
  }
  func.func @transform_6(%arg0: i32) -> (i32, i32) {
    %c0_i32 = arith.constant 0 : i32
    %c0_i32_0 = arith.constant 0 : i32
    %c0_i32_1 = arith.constant 0 : i32
    return %c0_i32, %c0_i32_0 : i32, i32
  }
  func.func @transform_7(%arg0: i32) -> (i32, i32) {
    %c0_i32 = arith.constant 0 : i32
    %c0_i32_0 = arith.constant 0 : i32
    return %arg0, %c0_i32 : i32, i32
  }
}

</mosaic_0001>

<bundles_post_ra>
// kernel: tpu_custom_call.1
= control target key start
LH: loop header
LB: loop body
LE: loop exit
PB: predicated region body
PF: predicated region fallthrough
CT: control target
= control target key end

     0   :  { %12 = vsyncpa [#allocation3], 0  ;;  %s2096_s0 = inlined_call_operand.vmem [shape: bf16[2,1024], index: 0, kind: input, shape index: {}]   ;;  %s2097_s1 = inlined_call_operand.hbm [shape: bf16[1024,256], index: 1, kind: input, shape index: {}]   ;;  %s2098_s2 = inlined_call_operand.vmem [shape: f32[1,256], index: 2, kind: input, shape index: {}]   ;;  %s2099_s3 = inlined_call_operand.vmem [shape: bf16[256,64], index: 3, kind: input, shape index: {}]   ;;  %s2100_s4 = inlined_call_operand.vmem [shape: f32[1,64], index: 4, kind: input, shape index: {}]   ;;  %s2101_s5 = inlined_call_operand.vmem [shape: bf16[64,128], index: 5, kind: input, shape index: {}]   ;;  %s2102_s6 = inlined_call_operand.vmem [shape: f32[1,128], index: 6, kind: input, shape index: {}]   ;;  %s2103_s7 = inlined_call_operand.hbm [shape: f32[2,128], index: 7, kind: output, shape index: {}]  }
   0x1   :  { %13 = vsyncpa [#allocation4], 0  ;;  %s1909_s24 = smov [#allocation2]  }
   0x2   :  { %s21_s25 = sshll.u32 %s1909_s24, 4  ;;  %s22_s25 = int_to_ptr.vmem [resolvable:$true] %s21_s25 }
   0x3   :  { %s1873_s26 = scalar_lea.vmem %s22_s25, 16384  ;;  %p1878_p1 = scmp.lt.s32.totalorder %s22_s25, %s22_s25 }
   0x4   :  { %p1874_p0 = scmp.ne.s32.totalorder %s22_s25, %s1873_s26  ;;  %p1879_p2 = scmp.lt.s32.totalorder %s1873_s26, %s1873_s26 }
   0x6   :  { %p1880_p3 = por %p1879_p2, %p1878_p1 }
   0x8   :  { %p1881_p4 = pnand %p1880_p3, %p1874_p0 }
   0xa   :  { %1884 = shalt.err (!%p1881_p4)
}
   0xb   :  { %s1910_s27 = smov 128   ;;  %s1911_s28 = smov 8  }
   0xc   :  { %27 = dma.hbm_to_vmem [thread:$0]  %s2097_s1, 16384, %s22_s25, [#allocation3], %s1910_s27, %s1910_s27, %s1911_s28  }
   0xd   :  { %1905 = dma.done.wait [#allocation3], 16384  }
   0xe   :  { %1906 = vsyncadd [#allocation3], 4294950912  ;;  %v1641_v0 = vld [vmem:[#allocation2 + $0x74] ss:$8 sps:$4 sm:$0xff]   ;;  %v1645_v2 = vld [vmem:[#allocation2 + $0x70] ss:$8 sps:$4 sm:$0xff]   ;;  %v180_v39 = vlaneseq }
   0xf   :  { %v1643_v1 = vld [vmem:[#allocation2 + $0x174] ss:$8 sps:$4 sm:$0xff]   ;;  %982 = vmatprep.subr.bf16.mxu0 %v1641_v0  ;;  %v1646_v3 = vld [vmem:[#allocation2 + $0x170] ss:$8 sps:$4 sm:$0xff]   ;;  %v1647_v4 = vld [vmem:[#allocation2 + $0x64] ss:$8 sps:$4 sm:$0xff]  }
  0x10   :  { %1025 = vmatprep.subr.bf16.mxu1 %v1643_v1  ;;  %983 = vmatpush1.bf16.msra.mxu0 %v1645_v2  ;;  %v1649_v5 = vld [vmem:[#allocation2 + $0x164] ss:$8 sps:$4 sm:$0xff]   ;;  %v1651_v6 = vld [vmem:[#allocation2 + $0x60] ss:$8 sps:$4 sm:$0xff]   ;;  %v1653_v8 = vld [vmem:[#allocation2 + $0x54] ss:$8 sps:$4 sm:$0xff]  }
  0x11   :  { %1026 = vmatpush1.bf16.msra.mxu1 %v1646_v3  ;;  %984 = vmatprep.subr.bf16.mxu0 %v1647_v4  ;;  %v1652_v7 = vld [vmem:[#allocation2 + $0x160] ss:$8 sps:$4 sm:$0xff]   ;;  %v1655_v9 = vld [vmem:[#allocation2 + $0x154] ss:$8 sps:$4 sm:$0xff]   ;;  %v1657_v10 = vld [vmem:[#allocation2 + $0x50] ss:$8 sps:$4 sm:$0xff]  }
  0x12   :  { %1027 = vmatprep.subr.bf16.mxu1 %v1649_v5  ;;  %v1658_v11 = vld [vmem:[#allocation2 + $0x150] ss:$8 sps:$4 sm:$0xff]   ;;  %v1659_v12 = vld [vmem:[#allocation2 + $0x44] ss:$8 sps:$4 sm:$0xff]   ;;  %v1663_v14 = vld [vmem:[#allocation2 + $0x40] ss:$8 sps:$4 sm:$0xff]  }
  0x13   :  { %v1661_v13 = vld [vmem:[#allocation2 + $0x144] ss:$8 sps:$4 sm:$0xff]   ;;  %v1664_v15 = vld [vmem:[#allocation2 + $0x140] ss:$8 sps:$4 sm:$0xff]   ;;  %v1665_v16 = vld [vmem:[#allocation2 + $0x34] ss:$8 sps:$4 sm:$0xff]  }
  0x14   :  { %985 = vmatpush1.bf16.msra.mxu0 %v1651_v6  ;;  %v1667_v17 = vld [vmem:[#allocation2 + $0x134] ss:$8 sps:$4 sm:$0xff]   ;;  %v1669_v18 = vld [vmem:[#allocation2 + $0x30] ss:$8 sps:$4 sm:$0xff]   ;;  %v1671_v20 = vld [vmem:[#allocation2 + $0x24] ss:$8 sps:$4 sm:$0xff]  }
  0x15   :  { %1028 = vmatpush1.bf16.msra.mxu1 %v1652_v7  ;;  %986 = vmatprep.subr.bf16.mxu0 %v1653_v8  ;;  %v1670_v19 = vld [vmem:[#allocation2 + $0x130] ss:$8 sps:$4 sm:$0xff]   ;;  %v1673_v21 = vld [vmem:[#allocation2 + $0x124] ss:$8 sps:$4 sm:$0xff]   ;;  %v1675_v22 = vld [vmem:[#allocation2 + $0x20] ss:$8 sps:$4 sm:$0xff]  }
  0x16   :  { %1029 = vmatprep.subr.bf16.mxu1 %v1655_v9  ;;  %v1676_v23 = vld [vmem:[#allocation2 + $0x120] ss:$8 sps:$4 sm:$0xff]   ;;  %v1677_v24 = vld [vmem:[#allocation2 + $0x14] ss:$8 sps:$4 sm:$0xff]   ;;  %v1681_v26 = vld [vmem:[#allocation2 + $0x10] ss:$8 sps:$4 sm:$0xff]  }
  0x17   :  { %v1679_v25 = vld [vmem:[#allocation2 + $0x114] ss:$8 sps:$4 sm:$0xff]   ;;  %v1682_v27 = vld [vmem:[#allocation2 + $0x110] ss:$8 sps:$4 sm:$0xff]   ;;  %v1683_v28 = vld [vmem:[#allocation2 + $0x4] ss:$8 sps:$4 sm:$0xff]  }
  0x18   :  { %987 = vmatpush1.bf16.msra.mxu0 %v1657_v10  ;;  %v1685_v29 = vld [vmem:[#allocation2 + $0x104] ss:$8 sps:$4 sm:$0xff]   ;;  %v1687_v30 = vld [vmem:[#allocation2] ss:$8 sps:$4 sm:$0xff]   ;;  %v1689_v32 = vld [vmem:[#allocation2 + $0xf4] ss:$8 sps:$4 sm:$0xff]  }
  0x19   :  { %1030 = vmatpush1.bf16.msra.mxu1 %v1658_v11  ;;  %988 = vmatprep.subr.bf16.mxu0 %v1659_v12  ;;  %v1688_v31 = vld [vmem:[#allocation2 + $0x100] ss:$8 sps:$4 sm:$0xff]   ;;  %v1691_v33 = vld [vmem:[#allocation2 + $0x1f4] ss:$8 sps:$4 sm:$0xff]   ;;  %v1693_v34 = vld [vmem:[#allocation2 + $0xf0] ss:$8 sps:$4 sm:$0xff]  }
  0x1a   :  { %1031 = vmatprep.subr.bf16.mxu1 %v1661_v13  ;;  %v1694_v35 = vld [vmem:[#allocation2 + $0x1f0] ss:$8 sps:$4 sm:$0xff]   ;;  %v1695_v36 = vld [vmem:[#allocation2 + $0xe4] ss:$8 sps:$4 sm:$0xff]   ;;  %v1699_v38 = vld [vmem:[#allocation2 + $0xe0] ss:$8 sps:$4 sm:$0xff]  }
  0x1b   :  { %v1697_v37 = vld [vmem:[#allocation2 + $0x1e4] ss:$8 sps:$4 sm:$0xff]   ;;  %v1912_v40 = vmov 1966171168   ;;  %v1700_v42 = vld [vmem:[#allocation2 + $0x1e0] ss:$8 sps:$4 sm:$0xff]  }
  0x1c   :  { %989 = vmatpush1.bf16.msra.mxu0 %v1663_v14  ;;  %v207_v41 = vunpack.c.l.s4 %v1912_v40  ;;  %v1701_v43 = vld [vmem:[#allocation2 + $0xd4] ss:$8 sps:$4 sm:$0xff]   ;;  %v1705_v45 = vld [vmem:[#allocation2 + $0xd0] ss:$8 sps:$4 sm:$0xff]   ;;  %v1961_v47 = vshrl.u32 %v180_v39, 7  ;;  %vm1914_vm0 = vmmov 0  }
  0x1d   :  { %1032 = vmatpush1.bf16.msra.mxu1 %v1664_v15  ;;  %990 = vmatprep.subr.bf16.mxu0 %v1665_v16  ;;  %v1703_v44 = vld [vmem:[#allocation2 + $0x1d4] ss:$8 sps:$4 sm:$0xff]   ;;  %v1706_v46 = vld [vmem:[#allocation2 + $0x1d0] ss:$8 sps:$4 sm:$0xff]   ;;  %v1707_v49 = vld [vmem:[#allocation2 + $0xc4] ss:$8 sps:$4 sm:$0xff]  }
  0x1e   :  { %1033 = vmatprep.subr.bf16.mxu1 %v1667_v17  ;;  %v208_v48 = vunpack.c.0.s8 %v207_v41  ;;  %v1709_v50 = vld [vmem:[#allocation2 + $0x1c4] ss:$8 sps:$4 sm:$0xff]   ;;  %v1711_v51 = vld [vmem:[#allocation2 + $0xc0] ss:$8 sps:$4 sm:$0xff]   ;;  %v1713_v53 = vld [vmem:[#allocation2 + $0xb4] ss:$8 sps:$4 sm:$0xff]  }
  0x1f   :  { %v1712_v52 = vld [vmem:[#allocation2 + $0x1c0] ss:$8 sps:$4 sm:$0xff]   ;;  %v1715_v55 = vld [vmem:[#allocation2 + $0x1b4] ss:$8 sps:$4 sm:$0xff]   ;;  %v1717_v57 = vld [vmem:[#allocation2 + $0xb0] ss:$8 sps:$4 sm:$0xff]  }
  0x20   :  { %991 = vmatpush1.bf16.msra.mxu0 %v1669_v18  ;;  %v1964_v54 = vsub.s32 %v208_v48, %v1961_v47  ;;  %v1737_v56 = vld [vmem:[%s2096_s0] ss:$8 sps:$4 sm:$0xff]   ;;  %v1718_v58 = vld [vmem:[#allocation2 + $0x1b0] ss:$8 sps:$4 sm:$0xff]   ;;  %v1719_v61 = vld [vmem:[#allocation2 + $0xa4] ss:$8 sps:$4 sm:$0xff]  }
  0x21   :  { %1034 = vmatpush1.bf16.msra.mxu1 %v1670_v19  ;;  %992 = vmatprep.subr.bf16.mxu0 %v1671_v20  ;;  %v1740_v59 = vld [vmem:[%s2096_s0 + $0x10] ss:$8 sps:$4 sm:$0xff]   ;;  %v1743_v60 = vld [vmem:[%s2096_s0 + $0x20] ss:$8 sps:$4 sm:$0xff]   ;;  %v1721_v62 = vld [vmem:[#allocation2 + $0x1a4] ss:$8 sps:$4 sm:$0xff]  }
  0x22   :  { %1035 = vmatprep.subr.bf16.mxu1 %v1673_v21  ;;  %v1746_v63 = vld [vmem:[%s2096_s0 + $0x30] ss:$8 sps:$4 sm:$0xff]   ;;  %v212_v0 = vrot.slane %v1737_v56, %v1964_v54  ;;  %v1739_v1 = vld [vmem:[%s2096_s0 + $0x4] ss:$8 sps:$4 sm:$0xff]   ;;  %v226_v2 = vrot.slane %v1740_v59, %v1964_v54  ;;  %v240_v3 = vrot.slane %v1743_v60, %v1964_v54  ;;  %v1742_v4 = vld [vmem:[%s2096_s0 + $0x14] ss:$8 sps:$4 sm:$0xff]  }
  0x23   :  { %v254_v5 = vrot.slane %v1746_v63, %v1964_v54  ;;  %v1745_v6 = vld [vmem:[%s2096_s0 + $0x24] ss:$8 sps:$4 sm:$0xff]   ;;  %v1748_v7 = vld [vmem:[%s2096_s0 + $0x34] ss:$8 sps:$4 sm:$0xff]   ;;  %v1723_v9 = vld [vmem:[#allocation2 + $0xa0] ss:$8 sps:$4 sm:$0xff]   ;;  %v1997_v16 = vrot.slane %v1739_v1, %v1964_v54  ;;  %v2000_v17 = vrot.slane %v1742_v4, %v1964_v54 }
  0x24   :  { %993 = vmatpush1.bf16.msra.mxu0 %v1675_v22  ;;  %v263_v8 = vcombine.high %v212_v0, %v226_v2  ;;  %v1724_v10 = vld [vmem:[#allocation2 + $0x1a0] ss:$8 sps:$4 sm:$0xff]   ;;  %v1725_v12 = vld [vmem:[#allocation2 + $0x94] ss:$8 sps:$4 sm:$0xff]   ;;  %v2003_v18 = vrot.slane %v1745_v6, %v1964_v54  ;;  %v2006_v19 = vrot.slane %v1748_v7, %v1964_v54  ;;  %v1729_v20 = vld [vmem:[#allocation2 + $0x90] ss:$8 sps:$4 sm:$0xff]  }
  0x25   :  { %1036 = vmatpush1.bf16.msra.mxu1 %v1676_v23  ;;  %994 = vmatprep.subr.bf16.mxu0 %v1677_v24  ;;  %v267_v11 = vcombine.high %v240_v3, %v254_v5  ;;  %v1727_v14 = vld [vmem:[#allocation2 + $0x194] ss:$8 sps:$4 sm:$0xff]   ;;  %v1730_v21 = vld [vmem:[#allocation2 + $0x190] ss:$8 sps:$4 sm:$0xff]   ;;  %v262_v24 = vcombine.low %v212_v0, %v226_v2  ;;  %v1758_v48 = vld [vmem:[#allocation2 + $0x360] ss:$8 sps:$4 sm:$0xff]  }
  0x26   :  { %1037 = vmatprep.subr.bf16.mxu1 %v1679_v25  ;;  %v290_v13 = vrot.slane %v263_v8, %v1964_v54  ;;  %v266_v25 = vcombine.low %v240_v3, %v254_v5  ;;  %v1749_v40 = vld [vmem:[#allocation2 + $0x270] ss:$8 sps:$4 sm:$0xff]   ;;  %v1767_v56 = vld [vmem:[#allocation2 + $0x240] ss:$8 sps:$4 sm:$0xff]   ;;  %v1778_v59 = vld [vmem:[#allocation2 + $0x334] ss:$8 sps:$4 sm:$0xff]  }
  0x27   :  { %v318_v15 = vrot.slane %v267_v11, %v1964_v54  ;;  %v1752_v41 = vld [vmem:[#allocation2 + $0x370] ss:$8 sps:$4 sm:$0xff]   ;;  %v1784_v63 = vld [vmem:[#allocation2 + $0x324] ss:$8 sps:$4 sm:$0xff]   ;;  %v1779_v0 = vld [vmem:[#allocation2 + $0x220] ss:$8 sps:$4 sm:$0xff]  }
  0x28   :  { %995 = vmatpush1.bf16.msra.mxu0 %v1681_v26  ;;  %v1731_v26 = vld [vmem:[#allocation2 + $0x84] ss:$8 sps:$4 sm:$0xff]   ;;  %v1773_v60 = vld [vmem:[#allocation2 + $0x230] ss:$8 sps:$4 sm:$0xff]   ;;  %v1782_v1 = vld [vmem:[#allocation2 + $0x320] ss:$8 sps:$4 sm:$0xff]  }
  0x29   :  { %1038 = vmatpush1.bf16.msra.mxu1 %v1682_v27  ;;  %996 = vmatprep.subr.bf16.mxu0 %v1683_v28  ;;  %v330_v22 = vcombine.low %v290_v13, %v318_v15  ;;  %v331_v23 = vcombine.high %v290_v13, %v318_v15  ;;  %v1733_v27 = vld [vmem:[#allocation2 + $0x184] ss:$8 sps:$4 sm:$0xff]   ;;  %v265_v28 = vcombine.high %v1997_v16, %v2000_v17  ;;  %v1787_v2 = vld [vmem:[#allocation2 + $0x214] ss:$8 sps:$4 sm:$0xff]   ;;  %v1785_v4 = vld [vmem:[#allocation2 + $0x210] ss:$8 sps:$4 sm:$0xff]  }
  0x2a   :  { %1039 = vmatprep.subr.bf16.mxu1 %v1685_v29  ;;  %v269_v29 = vcombine.high %v2003_v18, %v2006_v19  ;;  %v1790_v3 = vld [vmem:[#allocation2 + $0x314] ss:$8 sps:$4 sm:$0xff]   ;;  %v1788_v5 = vld [vmem:[#allocation2 + $0x310] ss:$8 sps:$4 sm:$0xff]   ;;  %v1793_v6 = vld [vmem:[#allocation2 + $0x204] ss:$8 sps:$4 sm:$0xff]  }
  0x2b   :  { %1014 = vmatprep.mubr.bf16.mxu0 %v330_v22  ;;  %1057 = vmatprep.mubr.bf16.mxu1 %v331_v23  ;;  %v1796_v7 = vld [vmem:[#allocation2 + $0x304] ss:$8 sps:$4 sm:$0xff]   ;;  %v1791_v8 = vld [vmem:[#allocation2 + $0x200] ss:$8 sps:$4 sm:$0xff]   ;;  %v1802_v11 = vld [vmem:[#allocation2 + $0x3f4] ss:$8 sps:$4 sm:$0xff]  }
  0x2c   :  { %997 = vmatpush1.bf16.msra.mxu0 %v1687_v30  ;;  %v1735_v30 = vld [vmem:[#allocation2 + $0x80] ss:$8 sps:$4 sm:$0xff]   ;;  %v1800_v13 = vld [vmem:[#allocation2 + $0x3f0] ss:$8 sps:$4 sm:$0xff]   ;;  %v1808_v15 = vld [vmem:[#allocation2 + $0x3e4] ss:$8 sps:$4 sm:$0xff]  }
  0x2d   :  { %1040 = vmatpush1.bf16.msra.mxu1 %v1688_v31  ;;  %998 = vmatprep.subr.bf16.mxu0 %v1689_v32  ;;  %v1736_v31 = vld [vmem:[#allocation2 + $0x180] ss:$8 sps:$4 sm:$0xff]   ;;  %v276_v32 = vrot.slane %v262_v24, %v1964_v54  ;;  %v1811_v22 = vld [vmem:[#allocation2 + $0x2d4] ss:$8 sps:$4 sm:$0xff]   ;;  %v1809_v24 = vld [vmem:[#allocation2 + $0x2d0] ss:$8 sps:$4 sm:$0xff]  }
  0x2e   :  { %1041 = vmatprep.subr.bf16.mxu1 %v1691_v33  ;;  %v304_v33 = vrot.slane %v266_v25, %v1964_v54  ;;  %v1814_v23 = vld [vmem:[#allocation2 + $0x3d4] ss:$8 sps:$4 sm:$0xff]   ;;  %v1812_v25 = vld [vmem:[#allocation2 + $0x3d0] ss:$8 sps:$4 sm:$0xff]   ;;  %vm1378_vm1 = vcmask 523264  }
  0x30   :  { %999 = vmatpush2.bf16.msra.mxu0 %v1693_v34  ;;  %v1751_v34 = vld [vmem:[#allocation2 + $0x274] ss:$8 sps:$4 sm:$0xff]   ;;  %v327_v39 = vcombine.high %v276_v32, %v304_v33 }
  0x31   :  { %1042 = vmatpush2.bf16.msra.mxu1 %v1694_v35  ;;  %1000 = vmatprep.subr.bf16.mxu0 %v1695_v36  ;;  %v1754_v35 = vld [vmem:[#allocation2 + $0x374] ss:$8 sps:$4 sm:$0xff]   ;;  %v297_v36 = vrot.slane %v265_v28, %v1964_v54  ;;  %v1815_v28 = vld [vmem:[#allocation2 + $0x2c0] ss:$8 sps:$4 sm:$0xff]  }
  0x32   :  { %1043 = vmatprep.subr.bf16.mxu1 %v1697_v37  ;;  %v325_v37 = vrot.slane %v269_v29, %v1964_v54  ;;  %v1818_v29 = vld [vmem:[#allocation2 + $0x3c0] ss:$8 sps:$4 sm:$0xff]  }
  0x34   :  { %1001 = vmatpush2.bf16.msra.mxu0 %v1699_v38  ;;  %v326_v38 = vcombine.low %v276_v32, %v304_v33  ;;  %v1821_v32 = vld [vmem:[#allocation2 + $0x2b0] ss:$8 sps:$4 sm:$0xff]  }
  0x35   :  { %1044 = vmatpush2.bf16.msra.mxu1 %v1700_v42  ;;  %1002 = vmatprep.subr.bf16.mxu0 %v1701_v43  ;;  %v1757_v42 = vld [vmem:[#allocation2 + $0x264] ss:$8 sps:$4 sm:$0xff]   ;;  %v1824_v33 = vld [vmem:[#allocation2 + $0x3b0] ss:$8 sps:$4 sm:$0xff]  }
  0x36   :  { %1045 = vmatprep.subr.bf16.mxu1 %v1703_v44  ;;  %v1760_v43 = vld [vmem:[#allocation2 + $0x364] ss:$8 sps:$4 sm:$0xff]   ;;  %v332_v44 = vcombine.low %v297_v36, %v325_v37 }
  0x38   :  { %1003 = vmatpush2.bf16.msra.mxu0 %v1705_v45  ;;  %v333_v45 = vcombine.high %v297_v36, %v325_v37  ;;  %v1827_v36 = vld [vmem:[#allocation2 + $0x2a0] ss:$8 sps:$4 sm:$0xff]  }
  0x39   :  { %1046 = vmatpush2.bf16.msra.mxu1 %v1706_v46  ;;  %1004 = vmatprep.subr.bf16.mxu0 %v1707_v49  ;;  %v1755_v46 = vld [vmem:[#allocation2 + $0x260] ss:$8 sps:$4 sm:$0xff]   ;;  %v1763_v49 = vld [vmem:[#allocation2 + $0x254] ss:$8 sps:$4 sm:$0xff]  }
  0x3a   :  { %1047 = vmatprep.subr.bf16.mxu1 %v1709_v50  ;;  %v1766_v50 = vld [vmem:[#allocation2 + $0x354] ss:$8 sps:$4 sm:$0xff]   ;;  %v1830_v37 = vld [vmem:[#allocation2 + $0x3a0] ss:$8 sps:$4 sm:$0xff]  }
  0x3c   :  { %1005 = vmatpush2.bf16.msra.mxu0 %v1711_v51  ;;  %v1761_v51 = vld [vmem:[#allocation2 + $0x250] ss:$8 sps:$4 sm:$0xff]  }
  0x3d   :  { %1048 = vmatpush2.bf16.msra.mxu1 %v1712_v52  ;;  %1006 = vmatprep.subr.bf16.mxu0 %v1713_v53  ;;  %v1764_v52 = vld [vmem:[#allocation2 + $0x350] ss:$8 sps:$4 sm:$0xff]   ;;  %v1769_v53 = vld [vmem:[#allocation2 + $0x244] ss:$8 sps:$4 sm:$0xff]  }
  0x3e   :  { %1049 = vmatprep.subr.bf16.mxu1 %v1715_v55  ;;  %v1772_v55 = vld [vmem:[#allocation2 + $0x344] ss:$8 sps:$4 sm:$0xff]  }
  0x40   :  { %1007 = vmatpush2.bf16.msra.mxu0 %v1717_v57  ;;  %v1770_v57 = vld [vmem:[#allocation2 + $0x340] ss:$8 sps:$4 sm:$0xff]  }
  0x41   :  { %1050 = vmatpush2.bf16.msra.mxu1 %v1718_v58  ;;  %1008 = vmatprep.subr.bf16.mxu0 %v1719_v61  ;;  %v1775_v58 = vld [vmem:[#allocation2 + $0x234] ss:$8 sps:$4 sm:$0xff]   ;;  %v1776_v61 = vld [vmem:[#allocation2 + $0x330] ss:$8 sps:$4 sm:$0xff]  }
  0x42   :  { %1051 = vmatprep.subr.bf16.mxu1 %v1721_v62  ;;  %v1781_v62 = vld [vmem:[#allocation2 + $0x224] ss:$8 sps:$4 sm:$0xff]  }
  0x44   :  { %1009 = vmatpush2.bf16.msra.mxu0 %v1723_v9  ;;  %v1794_v9 = vld [vmem:[#allocation2 + $0x300] ss:$8 sps:$4 sm:$0xff]  }
  0x45   :  { %1052 = vmatpush2.bf16.msra.mxu1 %v1724_v10  ;;  %1010 = vmatprep.subr.bf16.mxu0 %v1725_v12  ;;  %v1799_v10 = vld [vmem:[#allocation2 + $0x2f4] ss:$8 sps:$4 sm:$0xff]   ;;  %v1797_v12 = vld [vmem:[#allocation2 + $0x2f0] ss:$8 sps:$4 sm:$0xff]  }
  0x46   :  { %1053 = vmatprep.subr.bf16.mxu1 %v1727_v14  ;;  %v1805_v14 = vld [vmem:[#allocation2 + $0x2e4] ss:$8 sps:$4 sm:$0xff]  }
  0x48   :  { %1011 = vmatpush2.bf16.msra.mxu0 %v1729_v20  ;;  %v1803_v20 = vld [vmem:[#allocation2 + $0x2e0] ss:$8 sps:$4 sm:$0xff]  }
  0x49   :  { %1054 = vmatpush2.bf16.msra.mxu1 %v1730_v21  ;;  %1012 = vmatprep.subr.bf16.mxu0 %v1731_v26  ;;  %v1806_v21 = vld [vmem:[#allocation2 + $0x3e0] ss:$8 sps:$4 sm:$0xff]   ;;  %v1817_v26 = vld [vmem:[#allocation2 + $0x2c4] ss:$8 sps:$4 sm:$0xff]  }
  0x4a   :  { %1055 = vmatprep.subr.bf16.mxu1 %v1733_v27  ;;  %v1820_v27 = vld [vmem:[#allocation2 + $0x3c4] ss:$8 sps:$4 sm:$0xff]  }
  0x4c   :  { %1013 = vmatpush2.bf16.msra.mxu0 %v1735_v30  ;;  %v1823_v30 = vld [vmem:[#allocation2 + $0x2b4] ss:$8 sps:$4 sm:$0xff]  }
  0x4d   :  { %1056 = vmatpush2.bf16.msra.mxu1 %v1736_v31  ;;  %1068 = vmatprep.subr.bf16.mxu0 %v1751_v34  ;;  %v1826_v31 = vld [vmem:[#allocation2 + $0x3b4] ss:$8 sps:$4 sm:$0xff]   ;;  %v1829_v34 = vld [vmem:[#allocation2 + $0x2a4] ss:$8 sps:$4 sm:$0xff]  }
  0x4e   :  { %1111 = vmatprep.subr.bf16.mxu1 %v1754_v35  ;;  %v1832_v35 = vld [vmem:[#allocation2 + $0x3a4] ss:$8 sps:$4 sm:$0xff]  }
  0x4f   :  { %1015 = vmatmul.mubr.bf16.vlgmr.msra.gmra.mxu0 %v326_v38  ;;  %v1835_v38 = vld [vmem:[#allocation2 + $0x294] ss:$8 sps:$4 sm:$0xff]  }
  0x50   :  { %1058 = vmatmul.mubr.bf16.vlgmr.msra.gmra.mxu1 %v327_v39  ;;  %1069 = vmatpush1.bf16.msra.mxu0 %v1749_v40  ;;  %v1838_v39 = vld [vmem:[#allocation2 + $0x394] ss:$8 sps:$4 sm:$0xff]   ;;  %v264_v40 = vcombine.low %v1997_v16, %v2000_v17 }
  0x51   :  { %1112 = vmatpush1.bf16.msra.mxu1 %v1752_v41  ;;  %1070 = vmatprep.subr.bf16.mxu0 %v1757_v42  ;;  %v268_v41 = vcombine.low %v2003_v18, %v2006_v19  ;;  %v1833_v42 = vld [vmem:[#allocation2 + $0x290] ss:$8 sps:$4 sm:$0xff]  }
  0x52   :  { %1113 = vmatprep.subr.bf16.mxu1 %v1760_v43  ;;  %1100 = vmatprep.mubr.bf16.mxu0 %v332_v44  ;;  %v1836_v43 = vld [vmem:[#allocation2 + $0x390] ss:$8 sps:$4 sm:$0xff]   ;;  %v1841_v44 = vld [vmem:[#allocation2 + $0x284] ss:$8 sps:$4 sm:$0xff]  }
  0x53   :  { %1143 = vmatprep.mubr.bf16.mxu1 %v333_v45  ;;  %v1844_v45 = vld [vmem:[#allocation2 + $0x384] ss:$8 sps:$4 sm:$0xff]   ;;  %v1845_v18 = vld [vmem:[%s2099_s3 + $0x78] sm:$0xff]   ;;  %v1847_v19 = vld [vmem:[%s2099_s3 + $0x70] sm:$0xff]  }
  0x54   :  { %1071 = vmatpush1.bf16.msra.mxu0 %v1755_v46  ;;  %v283_v46 = vrot.slane %v264_v40, %v1964_v54 }
  0x55   :  { %1114 = vmatpush1.bf16.msra.mxu1 %v1758_v48  ;;  %1072 = vmatprep.subr.bf16.mxu0 %v1763_v49  ;;  %v311_v48 = vrot.slane %v268_v41, %v1964_v54  ;;  %v1839_v49 = vld [vmem:[#allocation2 + $0x280] ss:$8 sps:$4 sm:$0xff]   ;;  %v1846_v54 = vld [vmem:[%s2099_s3 + $0x38] sm:$0xff]  }
  0x56   :  { %1115 = vmatprep.subr.bf16.mxu1 %v1766_v50  ;;  %v1842_v50 = vld [vmem:[#allocation2 + $0x380] ss:$8 sps:$4 sm:$0xff]  }
  0x57   :  { %v328_v16 = vcombine.low %v283_v46, %v311_v48  ;;  %v329_v17 = vcombine.high %v283_v46, %v311_v48 }
  0x58   :  { %1073 = vmatpush1.bf16.msra.mxu0 %v1761_v51  ;;  %v1848_v51 = vld [vmem:[%s2099_s3 + $0x30] sm:$0xff]  }
  0x59   :  { %1116 = vmatpush1.bf16.msra.mxu1 %v1764_v52  ;;  %1074 = vmatprep.subr.bf16.mxu0 %v1769_v53  ;;  %v1849_v52 = vld [vmem:[%s2099_s3 + $0x68] sm:$0xff]  }
  0x5a   :  { %1117 = vmatprep.subr.bf16.mxu1 %v1772_v55  ;;  %v1850_v53 = vld [vmem:[%s2099_s3 + $0x28] sm:$0xff]   ;;  %v1851_v55 = vld [vmem:[%s2099_s3 + $0x60] sm:$0xff]  }
  0x5c   :  { %1075 = vmatpush1.bf16.msra.mxu0 %v1767_v56  ;;  %v1852_v56 = vld [vmem:[%s2099_s3 + $0x20] sm:$0xff]  }
  0x5d   :  { %1118 = vmatpush1.bf16.msra.mxu1 %v1770_v57  ;;  %1076 = vmatprep.subr.bf16.mxu0 %v1775_v58  ;;  %v1853_v57 = vld [vmem:[%s2099_s3 + $0x58] sm:$0xff]  }
  0x5e   :  { %1119 = vmatprep.subr.bf16.mxu1 %v1778_v59  ;;  %v1854_v58 = vld [vmem:[%s2099_s3 + $0x18] sm:$0xff]   ;;  %v1855_v59 = vld [vmem:[%s2099_s3 + $0x50] sm:$0xff]  }
  0x60   :  { %1077 = vmatpush1.bf16.msra.mxu0 %v1773_v60  ;;  %v1856_v60 = vld [vmem:[%s2099_s3 + $0x10] sm:$0xff]  }
  0x61   :  { %1120 = vmatpush1.bf16.msra.mxu1 %v1776_v61  ;;  %1078 = vmatprep.subr.bf16.mxu0 %v1781_v62  ;;  %v1857_v61 = vld [vmem:[%s2099_s3 + $0x48] sm:$0xff]  }
  0x62   :  { %1121 = vmatprep.subr.bf16.mxu1 %v1784_v63  ;;  %v1858_v62 = vld [vmem:[%s2099_s3 + $0x8] sm:$0xff]   ;;  %v1859_v63 = vld [vmem:[%s2099_s3 + $0x40] sm:$0xff]  }
  0x64   :  { %1079 = vmatpush1.bf16.msra.mxu0 %v1779_v0  ;;  %v1860_v0 = vld [vmem:[%s2099_s3] sm:$0xff]  }
  0x65   :  { %1122 = vmatpush1.bf16.msra.mxu1 %v1782_v1  ;;  %1080 = vmatprep.subr.bf16.mxu0 %v1787_v2  ;;  %v1913_v1 = vmov 0.0  }
  0x66   :  { %1123 = vmatprep.subr.bf16.mxu1 %v1790_v3 }
  0x68   :  { %1081 = vmatpush1.bf16.msra.mxu0 %v1785_v4  ;;  %v186_v4 = vsub.s32 1, %v1961_v47 }
  0x69   :  { %1124 = vmatpush1.bf16.msra.mxu1 %v1788_v5  ;;  %1082 = vmatprep.subr.bf16.mxu0 %v1793_v6  ;;  %v178_v5 = vld [vmem:[%s2098_s2] sm:$0x3]  ;;  %v182_v6 = vsub.s32 0, %v1961_v47 }
  0x6a   :  { %1125 = vmatprep.subr.bf16.mxu1 %v1796_v7 }
  0x6c   :  { %1083 = vmatpush1.bf16.msra.mxu0 %v1791_v8 }
  0x6d   :  { %1126 = vmatpush1.bf16.msra.mxu1 %v1794_v9  ;;  %1084 = vmatprep.subr.bf16.mxu0 %v1799_v10  ;;  %v187_v9 = vrot.slane %v178_v5, %v186_v4  ;;  %v183_v10 = vrot.slane %v178_v5, %v182_v6 }
  0x6e   :  { %1127 = vmatprep.subr.bf16.mxu1 %v1802_v11 }
  0x70   :  { %1085 = vmatpush2.bf16.msra.mxu0 %v1797_v12 }
  0x71   :  { %1128 = vmatpush2.bf16.msra.mxu1 %v1800_v13  ;;  %1086 = vmatprep.subr.bf16.mxu0 %v1805_v14 }
  0x72   :  { %1129 = vmatprep.subr.bf16.mxu1 %v1808_v15 }
  0x74   :  { %1087 = vmatpush2.bf16.msra.mxu0 %v1803_v20 }
  0x75   :  { %1130 = vmatpush2.bf16.msra.mxu1 %v1806_v21  ;;  %1088 = vmatprep.subr.bf16.mxu0 %v1811_v22 }
  0x76   :  { %1131 = vmatprep.subr.bf16.mxu1 %v1814_v23 }
  0x78   :  { %1089 = vmatpush2.bf16.msra.mxu0 %v1809_v24 }
  0x79   :  { %1132 = vmatpush2.bf16.msra.mxu1 %v1812_v25  ;;  %1090 = vmatprep.subr.bf16.mxu0 %v1817_v26 }
  0x7a   :  { %1133 = vmatprep.subr.bf16.mxu1 %v1820_v27 }
  0x7c   :  { %1091 = vmatpush2.bf16.msra.mxu0 %v1815_v28 }
  0x7d   :  { %1134 = vmatpush2.bf16.msra.mxu1 %v1818_v29  ;;  %1092 = vmatprep.subr.bf16.mxu0 %v1823_v30 }
  0x7e   :  { %1135 = vmatprep.subr.bf16.mxu1 %v1826_v31 }
  0x80   :  { %1093 = vmatpush2.bf16.msra.mxu0 %v1821_v32 }
  0x81   :  { %1136 = vmatpush2.bf16.msra.mxu1 %v1824_v33  ;;  %1094 = vmatprep.subr.bf16.mxu0 %v1829_v34 }
  0x82   :  { %1137 = vmatprep.subr.bf16.mxu1 %v1832_v35 }
  0x84   :  { %1095 = vmatpush2.bf16.msra.mxu0 %v1827_v36 }
  0x85   :  { %1138 = vmatpush2.bf16.msra.mxu1 %v1830_v37  ;;  %1096 = vmatprep.subr.bf16.mxu0 %v1835_v38 }
  0x86   :  { %1139 = vmatprep.subr.bf16.mxu1 %v1838_v39 }
  0x88   :  { %1097 = vmatpush2.bf16.msra.mxu0 %v1833_v42 }
  0x89   :  { %1140 = vmatpush2.bf16.msra.mxu1 %v1836_v43  ;;  %1098 = vmatprep.subr.bf16.mxu0 %v1841_v44 }
  0x8a   :  { %1141 = vmatprep.subr.bf16.mxu1 %v1844_v45 }
  0x8c   :  { %1099 = vmatpush2.bf16.msra.mxu0 %v1839_v49  ;;  %v1861_v49 = vld [vmem:[%s2101_s5 + $0x18] sm:$0xff]  }
  0x8d   :  { %1142 = vmatpush2.bf16.msra.mxu1 %v1842_v50  ;;  %1593 = vmatprep.subr.bf16.mxu0 %v1845_v18  ;;  %v1862_v50 = vld [vmem:[%s2101_s5 + $0x10] sm:$0xff]  }
  0x8e   :  { %1620 = vmatprep.subr.bf16.mxu1 %v1913_v1 }
  0x8f   :  { %1101 = vmatmul.mubr.bf16.vlgmr.msra.gmra.mxu0 %v328_v16  ;;  %v1863_v16 = vld [vmem:[%s2101_s5 + $0x8] sm:$0xff]  }
  0x90   :  { %1144 = vmatmul.mubr.bf16.vlgmr.msra.gmra.mxu1 %v329_v17  ;;  %1594 = vmatpush3.bf16.msra.mxu0 %v1846_v54  ;;  %v1864_v17 = vld [vmem:[%s2101_s5] sm:$0xff]  }
  0x91   :  { %1595 = vmatprep.subr.bf16.mxu0 %v1847_v19  ;;  %1621 = vmatpush3.bf16.msra.mxu1 %v1861_v49 }
  0x92   :  { %1622 = vmatprep.subr.bf16.mxu1 %v1913_v1  ;;  %1628 = vmatprep.mubr.msk.bf16.mxu1 %vm1914_vm0, %v1913_v1 }
  0x94   :  { %1596 = vmatpush3.bf16.msra.mxu0 %v1848_v51  ;;  %v1570_v51 = vld [vmem:[%s2100_s4] ss:$0 sm:$0xff] }
  0x95   :  { %1597 = vmatprep.subr.bf16.mxu0 %v1849_v52  ;;  %1623 = vmatpush3.bf16.msra.mxu1 %v1862_v50 }
  0x96   :  { %1624 = vmatprep.subr.bf16.mxu1 %v1913_v1 }
  0x98   :  { %1598 = vmatpush3.bf16.msra.mxu0 %v1850_v53 }
  0x99   :  { %1599 = vmatprep.subr.bf16.mxu0 %v1851_v55  ;;  %1625 = vmatpush3.bf16.msra.mxu1 %v1863_v16 }
  0x9a   :  { %1626 = vmatprep.subr.bf16.mxu1 %v1913_v1 }
  0x9c   :  { %1600 = vmatpush3.bf16.msra.mxu0 %v1852_v56 }
  0x9d   :  { %1601 = vmatprep.subr.bf16.mxu0 %v1853_v57  ;;  %1627 = vmatpush3.bf16.msra.mxu1 %v1864_v17 }
  0xa0   :  { %1602 = vmatpush3.bf16.msra.mxu0 %v1854_v58 }
  0xa1   :  { %1603 = vmatprep.subr.bf16.mxu0 %v1855_v59 }
  0xa4   :  { %1604 = vmatpush3.bf16.msra.mxu0 %v1856_v60 }
  0xa5   :  { %1605 = vmatprep.subr.bf16.mxu0 %v1857_v61  ;;  %v1587_v61 = vld [vmem:[%s2102_s6] ss:$0 sm:$0xff] }
  0xa8   :  { %1606 = vmatpush3.bf16.msra.mxu0 %v1858_v62 }
  0xa9   :  { %1607 = vmatprep.subr.bf16.mxu0 %v1859_v63 }
  0xac   :  { %1608 = vmatpush3.bf16.msra.mxu0 %v1860_v0 }
 0x10f   :  { %v1016_v2 = vpop.f32.mrf.mxu0 }
 0x110   :  { %v1059_v3 = vpop.f32.mrf.mxu1  ;;  %v1017_v14 = vadd.f32 %v1016_v2, %v183_v10 }
 0x111   :  { %v1018_v7 = vpop.f32.mrf.mxu0 }
 0x112   :  { %v1061_v8 = vpop.f32.mrf.mxu1  ;;  %v1019_v13 = vadd.f32 %v1018_v7, %v187_v9  ;;  %v1060_v26 = vadd.f32 %v1059_v3, %v1017_v14 }
 0x113   :  { %v1020_v11 = vpop.f32.mrf.mxu0 }
 0x114   :  { %v1063_v12 = vpop.f32.mrf.mxu1  ;;  %v1021_v21 = vadd.f32 %v1020_v11, %v183_v10  ;;  %v1062_v24 = vadd.f32 %v1061_v8, %v1019_v13 }
 0x115   :  { %v1022_v15 = vpop.f32.mrf.mxu0 }
 0x116   :  { %v1065_v20 = vpop.f32.mrf.mxu1  ;;  %v1023_v25 = vadd.f32 %v1022_v15, %v187_v9  ;;  %v1064_v29 = vadd.f32 %v1063_v12, %v1021_v21 }
 0x118   :  { %v1066_v33 = vadd.f32 %v1065_v20, %v1023_v25 }
 0x14f   :  { %v1102_v22 = vpop.f32.mrf.mxu0 }
 0x150   :  { %v1145_v23 = vpop.f32.mrf.mxu1  ;;  %v1103_v30 = vadd.f32 %v1102_v22, %v1060_v26 }
 0x151   :  { %v1104_v27 = vpop.f32.mrf.mxu0 }
 0x152   :  { %v1147_v28 = vpop.f32.mrf.mxu1  ;;  %v1105_v47 = vadd.f32 %v1104_v27, %v1062_v24  ;;  %v1146_v39 = vadd.f32 %v1145_v23, %v1103_v30 }
 0x153   :  { %v1106_v31 = vpop.f32.mrf.mxu0 }
 0x154   :  { %v1149_v32 = vpop.f32.mrf.mxu1  ;;  %v1107_v34 = vadd.f32 %v1106_v31, %v1064_v29  ;;  %v1148_v36 = vadd.f32 %v1147_v28, %v1105_v47  ;;  %v1154_v45 = vmax.f32 %v1146_v39, 0.0 }
 0x155   :  { %v1108_v35 = vpop.f32.mrf.mxu0 }
 0x156   :  { %v1150_v37 = vadd.f32 %v1149_v32, %v1107_v34  ;;  %v1109_v38 = vadd.f32 %v1108_v35, %v1066_v33  ;;  %v1151_v40 = vpop.f32.mrf.mxu1  ;;  %v1155_v43 = vmax.f32 %v1148_v36, 0.0 }
 0x158   :  { %v1152_v41 = vadd.f32 %v1151_v40, %v1109_v38  ;;  %v1156_v42 = vmax.f32 %v1150_v37, 0.0 }
 0x15a   :  { %v1157_v44 = vmax.f32 %v1152_v41, 0.0  ;;  %v1158_v48 = vpack.c.bf16 %v1156_v42, %v1154_v45 }
 0x15c   :  { %v1159_v46 = vpack.c.bf16 %v1157_v44, %v1155_v43 }
 0x15e   :  { %1327 = vmatprep.mubr.bf16.mxu0 %v1159_v46 }
 0x15f   :  { %1328 = vmatmul.mubr.bf16.vlgmr.msra.gmra.mxu0 %v1158_v48 }
 0x21f   :  { %v1609_v18 = vpop.f32.mrf.mxu0 }
 0x221   :  { %v1610_v54 = vpop.f32.mrf.mxu0 }
 0x222   :  { %v1611_v19 = vadd.f32 %v1610_v54, %v1609_v18 }
 0x223   :  { %v1612_v52 = vpop.f32.mrf.mxu0 }
 0x224   :  { %v1330_v55 = vadd.f32 %v1611_v19, %v1570_v51 }
 0x225   :  { %v1613_v53 = vpop.f32.mrf.mxu0 }
 0x226   :  { %v1614_v56 = vadd.f32 %v1613_v53, %v1612_v52  ;;  %v1336_v58 = vmax.f32 %v1330_v55, 0.0 }
 0x228   :  { %v1333_v57 = vadd.f32 %v1614_v56, %v1570_v51 }
 0x22a   :  { %v1337_v59 = vmax.f32 %v1333_v57, 0.0 }
 0x22c   :  { %v1338_v60 = vpack.c.bf16 %v1337_v59, %v1336_v58 }
 0x22e   :  { %1629 = vmatmul.mubr.msk.bf16.vlgmr.msra.gmra.mxu1 %vm1378_vm1, %v1338_v60 }
 0x2ee   :  { %v1416_v62 = vpop.f32.mrf.mxu1 }
 0x2ef   :  { %v1417_v63 = vadd.f32 %v1587_v61, %v1416_v62 }
 0x2f0   :  { %v1630_v0 = vpop.f32.mrf.mxu1 }
 0x2f1   :  { %1423 = vst [vmem:[#allocation5] sm:$0xff] %v1417_v63 }
 0x2f2   :  { %v1419_v1 = vpop.f32.mrf.mxu1 }
 0x2f3   :  { %v1420_v2 = vadd.f32 %v1587_v61, %v1419_v1 }
 0x2f4   :  { %v1631_v3 = vpop.f32.mrf.mxu1 }
 0x2f5   :  { %1424 = vst [vmem:[#allocation5 + $0x8] sm:$0xff] %v1420_v2 }
 0x2f6   :  { %1429 = vsyncadd [#allocation4], 224  ;;  %s1915_s4 = smov [#allocation5]  }
 0x2f7   :  { %s1430_s16 = sshll.u32 %s1915_s4, 4  ;;  %s1431_s16 = int_to_ptr.vmem [resolvable:$true] %s1430_s16 }
 0x2f8   :  { %s1885_s17 = scalar_lea.vmem %s1431_s16, 32  ;;  %s1889_s18 = scalar_lea.vmem %s1431_s16, 256 }
 0x2f9   :  { %p1886_p5 = scmp.ne.s32.totalorder %s1431_s16, %s1885_s17  ;;  %p1890_p6 = scmp.lt.s32.totalorder %s1431_s16, %s1431_s16 }
 0x2fa   :  { %p1891_p7 = scmp.lt.s32.totalorder %s1889_s18, %s1885_s17 }
 0x2fc   :  { %p1892_p8 = por %p1891_p7, %p1890_p6 }
 0x2fe   :  { %p1893_p9 = pnand %p1892_p8, %p1886_p5 }
 0x300   :  { %1896 = shalt.err (!%p1893_p9)
}
 0x301   :  { %s1916_s6 = smov 32   ;;  %s1917_s19 = smov 2  }
 0x302   :  { %1436 = dma.vmem_to_hbm [thread:$0]  %s1431_s16, 32, %s2103_s7, [#allocation4], %s1916_s6, %s1916_s6, %s1917_s19  }
 0x303   :  { %1907 = dma.done.wait [#allocation4], 256  }
 0x304   :  { %1908 = vsyncadd [#allocation4], 4294967040 }
 0x305   :  { %1440 = vsyncpa [#allocation3], 1 }
 0x306   :  { %1441 = vsyncpa [#allocation4], 1 }

// kernel: tpu_custom_call.1
= control target key start
LH: loop header
LB: loop body
LE: loop exit
PB: predicated region body
PF: predicated region fallthrough
CT: control target
= control target key end

     0   :  { %12 = vsyncpa [#allocation3], 0  ;;  %s2096_s0 = inlined_call_operand.vmem [shape: bf16[2,1024], index: 0, kind: input, shape index: {}]   ;;  %s2097_s1 = inlined_call_operand.hbm [shape: bf16[1024,256], index: 1, kind: input, shape index: {}]   ;;  %s2098_s2 = inlined_call_operand.vmem [shape: f32[1,256], index: 2, kind: input, shape index: {}]   ;;  %s2099_s3 = inlined_call_operand.vmem [shape: bf16[256,64], index: 3, kind: input, shape index: {}]   ;;  %s2100_s4 = inlined_call_operand.vmem [shape: f32[1,64], index: 4, kind: input, shape index: {}]   ;;  %s2101_s5 = inlined_call_operand.vmem [shape: bf16[64,128], index: 5, kind: input, shape index: {}]   ;;  %s2102_s6 = inlined_call_operand.vmem [shape: f32[1,128], index: 6, kind: input, shape index: {}]   ;;  %s2103_s7 = inlined_call_operand.hbm [shape: f32[2,128], index: 7, kind: output, shape index: {}]  }
   0x1   :  { %13 = vsyncpa [#allocation4], 0  ;;  %s1909_s24 = smov [#allocation2]  }
   0x2   :  { %s21_s25 = sshll.u32 %s1909_s24, 4  ;;  %s22_s25 = int_to_ptr.vmem [resolvable:$true] %s21_s25 }
   0x3   :  { %s1873_s26 = scalar_lea.vmem %s22_s25, 16384  ;;  %p1878_p1 = scmp.lt.s32.totalorder %s22_s25, %s22_s25 }
   0x4   :  { %p1874_p0 = scmp.ne.s32.totalorder %s22_s25, %s1873_s26  ;;  %p1879_p2 = scmp.lt.s32.totalorder %s1873_s26, %s1873_s26 }
   0x6   :  { %p1880_p3 = por %p1879_p2, %p1878_p1 }
   0x8   :  { %p1881_p4 = pnand %p1880_p3, %p1874_p0 }
   0xa   :  { %1884 = shalt.err (!%p1881_p4)
}
   0xb   :  { %s1910_s27 = smov 128   ;;  %s1911_s28 = smov 8  }
   0xc   :  { %27 = dma.hbm_to_vmem [thread:$0]  %s2097_s1, 16384, %s22_s25, [#allocation3], %s1910_s27, %s1910_s27, %s1911_s28  }
   0xd   :  { %1905 = dma.done.wait [#allocation3], 16384  }
   0xe   :  { %1906 = vsyncadd [#allocation3], 4294950912  ;;  %v1641_v0 = vld [vmem:[#allocation2 + $0x74] ss:$8 sps:$4 sm:$0xff]   ;;  %v1645_v2 = vld [vmem:[#allocation2 + $0x70] ss:$8 sps:$4 sm:$0xff]   ;;  %v180_v39 = vlaneseq }
   0xf   :  { %v1643_v1 = vld [vmem:[#allocation2 + $0x174] ss:$8 sps:$4 sm:$0xff]   ;;  %982 = vmatprep.subr.bf16.mxu0 %v1641_v0  ;;  %v1646_v3 = vld [vmem:[#allocation2 + $0x170] ss:$8 sps:$4 sm:$0xff]   ;;  %v1647_v4 = vld [vmem:[#allocation2 + $0x64] ss:$8 sps:$4 sm:$0xff]  }
  0x10   :  { %1025 = vmatprep.subr.bf16.mxu1 %v1643_v1  ;;  %983 = vmatpush1.bf16.msra.mxu0 %v1645_v2  ;;  %v1649_v5 = vld [vmem:[#allocation2 + $0x164] ss:$8 sps:$4 sm:$0xff]   ;;  %v1651_v6 = vld [vmem:[#allocation2 + $0x60] ss:$8 sps:$4 sm:$0xff]   ;;  %v1653_v8 = vld [vmem:[#allocation2 + $0x54] ss:$8 sps:$4 sm:$0xff]  }
  0x11   :  { %1026 = vmatpush1.bf16.msra.mxu1 %v1646_v3  ;;  %984 = vmatprep.subr.bf16.mxu0 %v1647_v4  ;;  %v1652_v7 = vld [vmem:[#allocation2 + $0x160] ss:$8 sps:$4 sm:$0xff]   ;;  %v1655_v9 = vld [vmem:[#allocation2 + $0x154] ss:$8 sps:$4 sm:$0xff]   ;;  %v1657_v10 = vld [vmem:[#allocation2 + $0x50] ss:$8 sps:$4 sm:$0xff]  }
  0x12   :  { %1027 = vmatprep.subr.bf16.mxu1 %v1649_v5  ;;  %v1658_v11 = vld [vmem:[#allocation2 + $0x150] ss:$8 sps:$4 sm:$0xff]   ;;  %v1659_v12 = vld [vmem:[#allocation2 + $0x44] ss:$8 sps:$4 sm:$0xff]   ;;  %v1663_v14 = vld [vmem:[#allocation2 + $0x40] ss:$8 sps:$4 sm:$0xff]  }
  0x13   :  { %v1661_v13 = vld [vmem:[#allocation2 + $0x144] ss:$8 sps:$4 sm:$0xff]   ;;  %v1664_v15 = vld [vmem:[#allocation2 + $0x140] ss:$8 sps:$4 sm:$0xff]   ;;  %v1665_v16 = vld [vmem:[#allocation2 + $0x34] ss:$8 sps:$4 sm:$0xff]  }
  0x14   :  { %985 = vmatpush1.bf16.msra.mxu0 %v1651_v6  ;;  %v1667_v17 = vld [vmem:[#allocation2 + $0x134] ss:$8 sps:$4 sm:$0xff]   ;;  %v1669_v18 = vld [vmem:[#allocation2 + $0x30] ss:$8 sps:$4 sm:$0xff]   ;;  %v1671_v20 = vld [vmem:[#allocation2 + $0x24] ss:$8 sps:$4 sm:$0xff]  }
  0x15   :  { %1028 = vmatpush1.bf16.msra.mxu1 %v1652_v7  ;;  %986 = vmatprep.subr.bf16.mxu0 %v1653_v8  ;;  %v1670_v19 = vld [vmem:[#allocation2 + $0x130] ss:$8 sps:$4 sm:$0xff]   ;;  %v1673_v21 = vld [vmem:[#allocation2 + $0x124] ss:$8 sps:$4 sm:$0xff]   ;;  %v1675_v22 = vld [vmem:[#allocation2 + $0x20] ss:$8 sps:$4 sm:$0xff]  }
  0x16   :  { %1029 = vmatprep.subr.bf16.mxu1 %v1655_v9  ;;  %v1676_v23 = vld [vmem:[#allocation2 + $0x120] ss:$8 sps:$4 sm:$0xff]   ;;  %v1677_v24 = vld [vmem:[#allocation2 + $0x14] ss:$8 sps:$4 sm:$0xff]   ;;  %v1681_v26 = vld [vmem:[#allocation2 + $0x10] ss:$8 sps:$4 sm:$0xff]  }
  0x17   :  { %v1679_v25 = vld [vmem:[#allocation2 + $0x114] ss:$8 sps:$4 sm:$0xff]   ;;  %v1682_v27 = vld [vmem:[#allocation2 + $0x110] ss:$8 sps:$4 sm:$0xff]   ;;  %v1683_v28 = vld [vmem:[#allocation2 + $0x4] ss:$8 sps:$4 sm:$0xff]  }
  0x18   :  { %987 = vmatpush1.bf16.msra.mxu0 %v1657_v10  ;;  %v1685_v29 = vld [vmem:[#allocation2 + $0x104] ss:$8 sps:$4 sm:$0xff]   ;;  %v1687_v30 = vld [vmem:[#allocation2] ss:$8 sps:$4 sm:$0xff]   ;;  %v1689_v32 = vld [vmem:[#allocation2 + $0xf4] ss:$8 sps:$4 sm:$0xff]  }
  0x19   :  { %1030 = vmatpush1.bf16.msra.mxu1 %v1658_v11  ;;  %988 = vmatprep.subr.bf16.mxu0 %v1659_v12  ;;  %v1688_v31 = vld [vmem:[#allocation2 + $0x100] ss:$8 sps:$4 sm:$0xff]   ;;  %v1691_v33 = vld [vmem:[#allocation2 + $0x1f4] ss:$8 sps:$4 sm:$0xff]   ;;  %v1693_v34 = vld [vmem:[#allocation2 + $0xf0] ss:$8 sps:$4 sm:$0xff]  }
  0x1a   :  { %1031 = vmatprep.subr.bf16.mxu1 %v1661_v13  ;;  %v1694_v35 = vld [vmem:[#allocation2 + $0x1f0] ss:$8 sps:$4 sm:$0xff]   ;;  %v1695_v36 = vld [vmem:[#allocation2 + $0xe4] ss:$8 sps:$4 sm:$0xff]   ;;  %v1699_v38 = vld [vmem:[#allocation2 + $0xe0] ss:$8 sps:$4 sm:$0xff]  }
  0x1b   :  { %v1697_v37 = vld [vmem:[#allocation2 + $0x1e4] ss:$8 sps:$4 sm:$0xff]   ;;  %v1912_v40 = vmov 1966171168   ;;  %v1700_v42 = vld [vmem:[#allocation2 + $0x1e0] ss:$8 sps:$4 sm:$0xff]  }
  0x1c   :  { %989 = vmatpush1.bf16.msra.mxu0 %v1663_v14  ;;  %v207_v41 = vunpack.c.l.s4 %v1912_v40  ;;  %v1701_v43 = vld [vmem:[#allocation2 + $0xd4] ss:$8 sps:$4 sm:$0xff]   ;;  %v1705_v45 = vld [vmem:[#allocation2 + $0xd0] ss:$8 sps:$4 sm:$0xff]   ;;  %v1961_v47 = vshrl.u32 %v180_v39, 7  ;;  %vm1914_vm0 = vmmov 0  }
  0x1d   :  { %1032 = vmatpush1.bf16.msra.mxu1 %v1664_v15  ;;  %990 = vmatprep.subr.bf16.mxu0 %v1665_v16  ;;  %v1703_v44 = vld [vmem:[#allocation2 + $0x1d4] ss:$8 sps:$4 sm:$0xff]   ;;  %v1706_v46 = vld [vmem:[#allocation2 + $0x1d0] ss:$8 sps:$4 sm:$0xff]   ;;  %v1707_v49 = vld [vmem:[#allocation2 + $0xc4] ss:$8 sps:$4 sm:$0xff]  }
  0x1e   :  { %1033 = vmatprep.subr.bf16.mxu1 %v1667_v17  ;;  %v208_v48 = vunpack.c.0.s8 %v207_v41  ;;  %v1709_v50 = vld [vmem:[#allocation2 + $0x1c4] ss:$8 sps:$4 sm:$0xff]   ;;  %v1711_v51 = vld [vmem:[#allocation2 + $0xc0] ss:$8 sps:$4 sm:$0xff]   ;;  %v1713_v53 = vld [vmem:[#allocation2 + $0xb4] ss:$8 sps:$4 sm:$0xff]  }
  0x1f   :  { %v1712_v52 = vld [vmem:[#allocation2 + $0x1c0] ss:$8 sps:$4 sm:$0xff]   ;;  %v1715_v55 = vld [vmem:[#allocation2 + $0x1b4] ss:$8 sps:$4 sm:$0xff]   ;;  %v1717_v57 = vld [vmem:[#allocation2 + $0xb0] ss:$8 sps:$4 sm:$0xff]  }
  0x20   :  { %991 = vmatpush1.bf16.msra.mxu0 %v1669_v18  ;;  %v1964_v54 = vsub.s32 %v208_v48, %v1961_v47  ;;  %v1737_v56 = vld [vmem:[%s2096_s0] ss:$8 sps:$4 sm:$0xff]   ;;  %v1718_v58 = vld [vmem:[#allocation2 + $0x1b0] ss:$8 sps:$4 sm:$0xff]   ;;  %v1719_v61 = vld [vmem:[#allocation2 + $0xa4] ss:$8 sps:$4 sm:$0xff]  }
  0x21   :  { %1034 = vmatpush1.bf16.msra.mxu1 %v1670_v19  ;;  %992 = vmatprep.subr.bf16.mxu0 %v1671_v20  ;;  %v1740_v59 = vld [vmem:[%s2096_s0 + $0x10] ss:$8 sps:$4 sm:$0xff]   ;;  %v1743_v60 = vld [vmem:[%s2096_s0 + $0x20] ss:$8 sps:$4 sm:$0xff]   ;;  %v1721_v62 = vld [vmem:[#allocation2 + $0x1a4] ss:$8 sps:$4 sm:$0xff]  }
  0x22   :  { %1035 = vmatprep.subr.bf16.mxu1 %v1673_v21  ;;  %v1746_v63 = vld [vmem:[%s2096_s0 + $0x30] ss:$8 sps:$4 sm:$0xff]   ;;  %v212_v0 = vrot.slane %v1737_v56, %v1964_v54  ;;  %v1739_v1 = vld [vmem:[%s2096_s0 + $0x4] ss:$8 sps:$4 sm:$0xff]   ;;  %v226_v2 = vrot.slane %v1740_v59, %v1964_v54  ;;  %v240_v3 = vrot.slane %v1743_v60, %v1964_v54  ;;  %v1742_v4 = vld [vmem:[%s2096_s0 + $0x14] ss:$8 sps:$4 sm:$0xff]  }
  0x23   :  { %v254_v5 = vrot.slane %v1746_v63, %v1964_v54  ;;  %v1745_v6 = vld [vmem:[%s2096_s0 + $0x24] ss:$8 sps:$4 sm:$0xff]   ;;  %v1748_v7 = vld [vmem:[%s2096_s0 + $0x34] ss:$8 sps:$4 sm:$0xff]   ;;  %v1723_v9 = vld [vmem:[#allocation2 + $0xa0] ss:$8 sps:$4 sm:$0xff]   ;;  %v1997_v16 = vrot.slane %v1739_v1, %v1964_v54  ;;  %v2000_v17 = vrot.slane %v1742_v4, %v1964_v54 }
  0x24   :  { %993 = vmatpush1.bf16.msra.mxu0 %v1675_v22  ;;  %v263_v8 = vcombine.high %v212_v0, %v226_v2  ;;  %v1724_v10 = vld [vmem:[#allocation2 + $0x1a0] ss:$8 sps:$4 sm:$0xff]   ;;  %v1725_v12 = vld [vmem:[#allocation2 + $0x94] ss:$8 sps:$4 sm:$0xff]   ;;  %v2003_v18 = vrot.slane %v1745_v6, %v1964_v54  ;;  %v2006_v19 = vrot.slane %v1748_v7, %v1964_v54  ;;  %v1729_v20 = vld [vmem:[#allocation2 + $0x90] ss:$8 sps:$4 sm:$0xff]  }
  0x25   :  { %1036 = vmatpush1.bf16.msra.mxu1 %v1676_v23  ;;  %994 = vmatprep.subr.bf16.mxu0 %v1677_v24  ;;  %v267_v11 = vcombine.high %v240_v3, %v254_v5  ;;  %v1727_v14 = vld [vmem:[#allocation2 + $0x194] ss:$8 sps:$4 sm:$0xff]   ;;  %v1730_v21 = vld [vmem:[#allocation2 + $0x190] ss:$8 sps:$4 sm:$0xff]   ;;  %v262_v24 = vcombine.low %v212_v0, %v226_v2  ;;  %v1758_v48 = vld [vmem:[#allocation2 + $0x360] ss:$8 sps:$4 sm:$0xff]  }
  0x26   :  { %1037 = vmatprep.subr.bf16.mxu1 %v1679_v25  ;;  %v290_v13 = vrot.slane %v263_v8, %v1964_v54  ;;  %v266_v25 = vcombine.low %v240_v3, %v254_v5  ;;  %v1749_v40 = vld [vmem:[#allocation2 + $0x270] ss:$8 sps:$4 sm:$0xff]   ;;  %v1767_v56 = vld [vmem:[#allocation2 + $0x240] ss:$8 sps:$4 sm:$0xff]   ;;  %v1778_v59 = vld [vmem:[#allocation2 + $0x334] ss:$8 sps:$4 sm:$0xff]  }
  0x27   :  { %v318_v15 = vrot.slane %v267_v11, %v1964_v54  ;;  %v1752_v41 = vld [vmem:[#allocation2 + $0x370] ss:$8 sps:$4 sm:$0xff]   ;;  %v1784_v63 = vld [vmem:[#allocation2 + $0x324] ss:$8 sps:$4 sm:$0xff]   ;;  %v1779_v0 = vld [vmem:[#allocation2 + $0x220] ss:$8 sps:$4 sm:$0xff]  }
  0x28   :  { %995 = vmatpush1.bf16.msra.mxu0 %v1681_v26  ;;  %v1731_v26 = vld [vmem:[#allocation2 + $0x84] ss:$8 sps:$4 sm:$0xff]   ;;  %v1773_v60 = vld [vmem:[#allocation2 + $0x230] ss:$8 sps:$4 sm:$0xff]   ;;  %v1782_v1 = vld [vmem:[#allocation2 + $0x320] ss:$8 sps:$4 sm:$0xff]  }
  0x29   :  { %1038 = vmatpush1.bf16.msra.mxu1 %v1682_v27  ;;  %996 = vmatprep.subr.bf16.mxu0 %v1683_v28  ;;  %v330_v22 = vcombine.low %v290_v13, %v318_v15  ;;  %v331_v23 = vcombine.high %v290_v13, %v318_v15  ;;  %v1733_v27 = vld [vmem:[#allocation2 + $0x184] ss:$8 sps:$4 sm:$0xff]   ;;  %v265_v28 = vcombine.high %v1997_v16, %v2000_v17  ;;  %v1787_v2 = vld [vmem:[#allocation2 + $0x214] ss:$8 sps:$4 sm:$0xff]   ;;  %v1785_v4 = vld [vmem:[#allocation2 + $0x210] ss:$8 sps:$4 sm:$0xff]  }
  0x2a   :  { %1039 = vmatprep.subr.bf16.mxu1 %v1685_v29  ;;  %v269_v29 = vcombine.high %v2003_v18, %v2006_v19  ;;  %v1790_v3 = vld [vmem:[#allocation2 + $0x314] ss:$8 sps:$4 sm:$0xff]   ;;  %v1788_v5 = vld [vmem:[#allocation2 + $0x310] ss:$8 sps:$4 sm:$0xff]   ;;  %v1793_v6 = vld [vmem:[#allocation2 + $0x204] ss:$8 sps:$4 sm:$0xff]  }
  0x2b   :  { %1014 = vmatprep.mubr.bf16.mxu0 %v330_v22  ;;  %1057 = vmatprep.mubr.bf16.mxu1 %v331_v23  ;;  %v1796_v7 = vld [vmem:[#allocation2 + $0x304] ss:$8 sps:$4 sm:$0xff]   ;;  %v1791_v8 = vld [vmem:[#allocation2 + $0x200] ss:$8 sps:$4 sm:$0xff]   ;;  %v1802_v11 = vld [vmem:[#allocation2 + $0x3f4] ss:$8 sps:$4 sm:$0xff]  }
  0x2c   :  { %997 = vmatpush1.bf16.msra.mxu0 %v1687_v30  ;;  %v1735_v30 = vld [vmem:[#allocation2 + $0x80] ss:$8 sps:$4 sm:$0xff]   ;;  %v1800_v13 = vld [vmem:[#allocation2 + $0x3f0] ss:$8 sps:$4 sm:$0xff]   ;;  %v1808_v15 = vld [vmem:[#allocation2 + $0x3e4] ss:$8 sps:$4 sm:$0xff]  }
  0x2d   :  { %1040 = vmatpush1.bf16.msra.mxu1 %v1688_v31  ;;  %998 = vmatprep.subr.bf16.mxu0 %v1689_v32  ;;  %v1736_v31 = vld [vmem:[#allocation2 + $0x180] ss:$8 sps:$4 sm:$0xff]   ;;  %v276_v32 = vrot.slane %v262_v24, %v1964_v54  ;;  %v1811_v22 = vld [vmem:[#allocation2 + $0x2d4] ss:$8 sps:$4 sm:$0xff]   ;;  %v1809_v24 = vld [vmem:[#allocation2 + $0x2d0] ss:$8 sps:$4 sm:$0xff]  }
  0x2e   :  { %1041 = vmatprep.subr.bf16.mxu1 %v1691_v33  ;;  %v304_v33 = vrot.slane %v266_v25, %v1964_v54  ;;  %v1814_v23 = vld [vmem:[#allocation2 + $0x3d4] ss:$8 sps:$4 sm:$0xff]   ;;  %v1812_v25 = vld [vmem:[#allocation2 + $0x3d0] ss:$8 sps:$4 sm:$0xff]   ;;  %vm1378_vm1 = vcmask 523264  }
  0x30   :  { %999 = vmatpush2.bf16.msra.mxu0 %v1693_v34  ;;  %v1751_v34 = vld [vmem:[#allocation2 + $0x274] ss:$8 sps:$4 sm:$0xff]   ;;  %v327_v39 = vcombine.high %v276_v32, %v304_v33 }
  0x31   :  { %1042 = vmatpush2.bf16.msra.mxu1 %v1694_v35  ;;  %1000 = vmatprep.subr.bf16.mxu0 %v1695_v36  ;;  %v1754_v35 = vld [vmem:[#allocation2 + $0x374] ss:$8 sps:$4 sm:$0xff]   ;;  %v297_v36 = vrot.slane %v265_v28, %v1964_v54  ;;  %v1815_v28 = vld [vmem:[#allocation2 + $0x2c0] ss:$8 sps:$4 sm:$0xff]  }
  0x32   :  { %1043 = vmatprep.subr.bf16.mxu1 %v1697_v37  ;;  %v325_v37 = vrot.slane %v269_v29, %v1964_v54  ;;  %v1818_v29 = vld [vmem:[#allocation2 + $0x3c0] ss:$8 sps:$4 sm:$0xff]  }
  0x34   :  { %1001 = vmatpush2.bf16.msra.mxu0 %v1699_v38  ;;  %v326_v38 = vcombine.low %v276_v32, %v304_v33  ;;  %v1821_v32 = vld [vmem:[#allocation2 + $0x2b0] ss:$8 sps:$4 sm:$0xff]  }
  0x35   :  { %1044 = vmatpush2.bf16.msra.mxu1 %v1700_v42  ;;  %1002 = vmatprep.subr.bf16.mxu0 %v1701_v43  ;;  %v1757_v42 = vld [vmem:[#allocation2 + $0x264] ss:$8 sps:$4 sm:$0xff]   ;;  %v1824_v33 = vld [vmem:[#allocation2 + $0x3b0] ss:$8 sps:$4 sm:$0xff]  }
  0x36   :  { %1045 = vmatprep.subr.bf16.mxu1 %v1703_v44  ;;  %v1760_v43 = vld [vmem:[#allocation2 + $0x364] ss:$8 sps:$4 sm:$0xff]   ;;  %v332_v44 = vcombine.low %v297_v36, %v325_v37 }
  0x38   :  { %1003 = vmatpush2.bf16.msra.mxu0 %v1705_v45  ;;  %v333_v45 = vcombine.high %v297_v36, %v325_v37  ;;  %v1827_v36 = vld [vmem:[#allocation2 + $0x2a0] ss:$8 sps:$4 sm:$0xff]  }
  0x39   :  { %1046 = vmatpush2.bf16.msra.mxu1 %v1706_v46  ;;  %1004 = vmatprep.subr.bf16.mxu0 %v1707_v49  ;;  %v1755_v46 = vld [vmem:[#allocation2 + $0x260] ss:$8 sps:$4 sm:$0xff]   ;;  %v1763_v49 = vld [vmem:[#allocation2 + $0x254] ss:$8 sps:$4 sm:$0xff]  }
  0x3a   :  { %1047 = vmatprep.subr.bf16.mxu1 %v1709_v50  ;;  %v1766_v50 = vld [vmem:[#allocation2 + $0x354] ss:$8 sps:$4 sm:$0xff]   ;;  %v1830_v37 = vld [vmem:[#allocation2 + $0x3a0] ss:$8 sps:$4 sm:$0xff]  }
  0x3c   :  { %1005 = vmatpush2.bf16.msra.mxu0 %v1711_v51  ;;  %v1761_v51 = vld [vmem:[#allocation2 + $0x250] ss:$8 sps:$4 sm:$0xff]  }
  0x3d   :  { %1048 = vmatpush2.bf16.msra.mxu1 %v1712_v52  ;;  %1006 = vmatprep.subr.bf16.mxu0 %v1713_v53  ;;  %v1764_v52 = vld [vmem:[#allocation2 + $0x350] ss:$8 sps:$4 sm:$0xff]   ;;  %v1769_v53 = vld [vmem:[#allocation2 + $0x244] ss:$8 sps:$4 sm:$0xff]  }
  0x3e   :  { %1049 = vmatprep.subr.bf16.mxu1 %v1715_v55  ;;  %v1772_v55 = vld [vmem:[#allocation2 + $0x344] ss:$8 sps:$4 sm:$0xff]  }
  0x40   :  { %1007 = vmatpush2.bf16.msra.mxu0 %v1717_v57  ;;  %v1770_v57 = vld [vmem:[#allocation2 + $0x340] ss:$8 sps:$4 sm:$0xff]  }
  0x41   :  { %1050 = vmatpush2.bf16.msra.mxu1 %v1718_v58  ;;  %1008 = vmatprep.subr.bf16.mxu0 %v1719_v61  ;;  %v1775_v58 = vld [vmem:[#allocation2 + $0x234] ss:$8 sps:$4 sm:$0xff]   ;;  %v1776_v61 = vld [vmem:[#allocation2 + $0x330] ss:$8 sps:$4 sm:$0xff]  }
  0x42   :  { %1051 = vmatprep.subr.bf16.mxu1 %v1721_v62  ;;  %v1781_v62 = vld [vmem:[#allocation2 + $0x224] ss:$8 sps:$4 sm:$0xff]  }
  0x44   :  { %1009 = vmatpush2.bf16.msra.mxu0 %v1723_v9  ;;  %v1794_v9 = vld [vmem:[#allocation2 + $0x300] ss:$8 sps:$4 sm:$0xff]  }
  0x45   :  { %1052 = vmatpush2.bf16.msra.mxu1 %v1724_v10  ;;  %1010 = vmatprep.subr.bf16.mxu0 %v1725_v12  ;;  %v1799_v10 = vld [vmem:[#allocation2 + $0x2f4] ss:$8 sps:$4 sm:$0xff]   ;;  %v1797_v12 = vld [vmem:[#allocation2 + $0x2f0] ss:$8 sps:$4 sm:$0xff]  }
  0x46   :  { %1053 = vmatprep.subr.bf16.mxu1 %v1727_v14  ;;  %v1805_v14 = vld [vmem:[#allocation2 + $0x2e4] ss:$8 sps:$4 sm:$0xff]  }
  0x48   :  { %1011 = vmatpush2.bf16.msra.mxu0 %v1729_v20  ;;  %v1803_v20 = vld [vmem:[#allocation2 + $0x2e0] ss:$8 sps:$4 sm:$0xff]  }
  0x49   :  { %1054 = vmatpush2.bf16.msra.mxu1 %v1730_v21  ;;  %1012 = vmatprep.subr.bf16.mxu0 %v1731_v26  ;;  %v1806_v21 = vld [vmem:[#allocation2 + $0x3e0] ss:$8 sps:$4 sm:$0xff]   ;;  %v1817_v26 = vld [vmem:[#allocation2 + $0x2c4] ss:$8 sps:$4 sm:$0xff]  }
  0x4a   :  { %1055 = vmatprep.subr.bf16.mxu1 %v1733_v27  ;;  %v1820_v27 = vld [vmem:[#allocation2 + $0x3c4] ss:$8 sps:$4 sm:$0xff]  }
  0x4c   :  { %1013 = vmatpush2.bf16.msra.mxu0 %v1735_v30  ;;  %v1823_v30 = vld [vmem:[#allocation2 + $0x2b4] ss:$8 sps:$4 sm:$0xff]  }
  0x4d   :  { %1056 = vmatpush2.bf16.msra.mxu1 %v1736_v31  ;;  %1068 = vmatprep.subr.bf16.mxu0 %v1751_v34  ;;  %v1826_v31 = vld [vmem:[#allocation2 + $0x3b4] ss:$8 sps:$4 sm:$0xff]   ;;  %v1829_v34 = vld [vmem:[#allocation2 + $0x2a4] ss:$8 sps:$4 sm:$0xff]  }
  0x4e   :  { %1111 = vmatprep.subr.bf16.mxu1 %v1754_v35  ;;  %v1832_v35 = vld [vmem:[#allocation2 + $0x3a4] ss:$8 sps:$4 sm:$0xff]  }
  0x4f   :  { %1015 = vmatmul.mubr.bf16.vlgmr.msra.gmra.mxu0 %v326_v38  ;;  %v1835_v38 = vld [vmem:[#allocation2 + $0x294] ss:$8 sps:$4 sm:$0xff]  }
  0x50   :  { %1058 = vmatmul.mubr.bf16.vlgmr.msra.gmra.mxu1 %v327_v39  ;;  %1069 = vmatpush1.bf16.msra.mxu0 %v1749_v40  ;;  %v1838_v39 = vld [vmem:[#allocation2 + $0x394] ss:$8 sps:$4 sm:$0xff]   ;;  %v264_v40 = vcombine.low %v1997_v16, %v2000_v17 }
  0x51   :  { %1112 = vmatpush1.bf16.msra.mxu1 %v1752_v41  ;;  %1070 = vmatprep.subr.bf16.mxu0 %v1757_v42  ;;  %v268_v41 = vcombine.low %v2003_v18, %v2006_v19  ;;  %v1833_v42 = vld [vmem:[#allocation2 + $0x290] ss:$8 sps:$4 sm:$0xff]  }
  0x52   :  { %1113 = vmatprep.subr.bf16.mxu1 %v1760_v43  ;;  %1100 = vmatprep.mubr.bf16.mxu0 %v332_v44  ;;  %v1836_v43 = vld [vmem:[#allocation2 + $0x390] ss:$8 sps:$4 sm:$0xff]   ;;  %v1841_v44 = vld [vmem:[#allocation2 + $0x284] ss:$8 sps:$4 sm:$0xff]  }
  0x53   :  { %1143 = vmatprep.mubr.bf16.mxu1 %v333_v45  ;;  %v1844_v45 = vld [vmem:[#allocation2 + $0x384] ss:$8 sps:$4 sm:$0xff]   ;;  %v1845_v18 = vld [vmem:[%s2099_s3 + $0x78] sm:$0xff]   ;;  %v1847_v19 = vld [vmem:[%s2099_s3 + $0x70] sm:$0xff]  }
  0x54   :  { %1071 = vmatpush1.bf16.msra.mxu0 %v1755_v46  ;;  %v283_v46 = vrot.slane %v264_v40, %v1964_v54 }
  0x55   :  { %1114 = vmatpush1.bf16.msra.mxu1 %v1758_v48  ;;  %1072 = vmatprep.subr.bf16.mxu0 %v1763_v49  ;;  %v311_v48 = vrot.slane %v268_v41, %v1964_v54  ;;  %v1839_v49 = vld [vmem:[#allocation2 + $0x280] ss:$8 sps:$4 sm:$0xff]   ;;  %v1846_v54 = vld [vmem:[%s2099_s3 + $0x38] sm:$0xff]  }
  0x56   :  { %1115 = vmatprep.subr.bf16.mxu1 %v1766_v50  ;;  %v1842_v50 = vld [vmem:[#allocation2 + $0x380] ss:$8 sps:$4 sm:$0xff]  }
  0x57   :  { %v328_v16 = vcombine.low %v283_v46, %v311_v48  ;;  %v329_v17 = vcombine.high %v283_v46, %v311_v48 }
  0x58   :  { %1073 = vmatpush1.bf16.msra.mxu0 %v1761_v51  ;;  %v1848_v51 = vld [vmem:[%s2099_s3 + $0x30] sm:$0xff]  }
  0x59   :  { %1116 = vmatpush1.bf16.msra.mxu1 %v1764_v52  ;;  %1074 = vmatprep.subr.bf16.mxu0 %v1769_v53  ;;  %v1849_v52 = vld [vmem:[%s2099_s3 + $0x68] sm:$0xff]  }
  0x5a   :  { %1117 = vmatprep.subr.bf16.mxu1 %v1772_v55  ;;  %v1850_v53 = vld [vmem:[%s2099_s3 + $0x28] sm:$0xff]   ;;  %v1851_v55 = vld [vmem:[%s2099_s3 + $0x60] sm:$0xff]  }
  0x5c   :  { %1075 = vmatpush1.bf16.msra.mxu0 %v1767_v56  ;;  %v1852_v56 = vld [vmem:[%s2099_s3 + $0x20] sm:$0xff]  }
  0x5d   :  { %1118 = vmatpush1.bf16.msra.mxu1 %v1770_v57  ;;  %1076 = vmatprep.subr.bf16.mxu0 %v1775_v58  ;;  %v1853_v57 = vld [vmem:[%s2099_s3 + $0x58] sm:$0xff]  }
  0x5e   :  { %1119 = vmatprep.subr.bf16.mxu1 %v1778_v59  ;;  %v1854_v58 = vld [vmem:[%s2099_s3 + $0x18] sm:$0xff]   ;;  %v1855_v59 = vld [vmem:[%s2099_s3 + $0x50] sm:$0xff]  }
  0x60   :  { %1077 = vmatpush1.bf16.msra.mxu0 %v1773_v60  ;;  %v1856_v60 = vld [vmem:[%s2099_s3 + $0x10] sm:$0xff]  }
  0x61   :  { %1120 = vmatpush1.bf16.msra.mxu1 %v1776_v61  ;;  %1078 = vmatprep.subr.bf16.mxu0 %v1781_v62  ;;  %v1857_v61 = vld [vmem:[%s2099_s3 + $0x48] sm:$0xff]  }
  0x62   :  { %1121 = vmatprep.subr.bf16.mxu1 %v1784_v63  ;;  %v1858_v62 = vld [vmem:[%s2099_s3 + $0x8] sm:$0xff]   ;;  %v1859_v63 = vld [vmem:[%s2099_s3 + $0x40] sm:$0xff]  }
  0x64   :  { %1079 = vmatpush1.bf16.msra.mxu0 %v1779_v0  ;;  %v1860_v0 = vld [vmem:[%s2099_s3] sm:$0xff]  }
  0x65   :  { %1122 = vmatpush1.bf16.msra.mxu1 %v1782_v1  ;;  %1080 = vmatprep.subr.bf16.mxu0 %v1787_v2  ;;  %v1913_v1 = vmov 0.0  }
  0x66   :  { %1123 = vmatprep.subr.bf16.mxu1 %v1790_v3 }
  0x68   :  { %1081 = vmatpush1.bf16.msra.mxu0 %v1785_v4  ;;  %v186_v4 = vsub.s32 1, %v1961_v47 }
  0x69   :  { %1124 = vmatpush1.bf16.msra.mxu1 %v1788_v5  ;;  %1082 = vmatprep.subr.bf16.mxu0 %v1793_v6  ;;  %v178_v5 = vld [vmem:[%s2098_s2] sm:$0x3]  ;;  %v182_v6 = vsub.s32 0, %v1961_v47 }
  0x6a   :  { %1125 = vmatprep.subr.bf16.mxu1 %v1796_v7 }
  0x6c   :  { %1083 = vmatpush1.bf16.msra.mxu0 %v1791_v8 }
  0x6d   :  { %1126 = vmatpush1.bf16.msra.mxu1 %v1794_v9  ;;  %1084 = vmatprep.subr.bf16.mxu0 %v1799_v10  ;;  %v187_v9 = vrot.slane %v178_v5, %v186_v4  ;;  %v183_v10 = vrot.slane %v178_v5, %v182_v6 }
  0x6e   :  { %1127 = vmatprep.subr.bf16.mxu1 %v1802_v11 }
  0x70   :  { %1085 = vmatpush2.bf16.msra.mxu0 %v1797_v12 }
  0x71   :  { %1128 = vmatpush2.bf16.msra.mxu1 %v1800_v13  ;;  %1086 = vmatprep.subr.bf16.mxu0 %v1805_v14 }
  0x72   :  { %1129 = vmatprep.subr.bf16.mxu1 %v1808_v15 }
  0x74   :  { %1087 = vmatpush2.bf16.msra.mxu0 %v1803_v20 }
  0x75   :  { %1130 = vmatpush2.bf16.msra.mxu1 %v1806_v21  ;;  %1088 = vmatprep.subr.bf16.mxu0 %v1811_v22 }
  0x76   :  { %1131 = vmatprep.subr.bf16.mxu1 %v1814_v23 }
  0x78   :  { %1089 = vmatpush2.bf16.msra.mxu0 %v1809_v24 }
  0x79   :  { %1132 = vmatpush2.bf16.msra.mxu1 %v1812_v25  ;;  %1090 = vmatprep.subr.bf16.mxu0 %v1817_v26 }
  0x7a   :  { %1133 = vmatprep.subr.bf16.mxu1 %v1820_v27 }
  0x7c   :  { %1091 = vmatpush2.bf16.msra.mxu0 %v1815_v28 }
  0x7d   :  { %1134 = vmatpush2.bf16.msra.mxu1 %v1818_v29  ;;  %1092 = vmatprep.subr.bf16.mxu0 %v1823_v30 }
  0x7e   :  { %1135 = vmatprep.subr.bf16.mxu1 %v1826_v31 }
  0x80   :  { %1093 = vmatpush2.bf16.msra.mxu0 %v1821_v32 }
  0x81   :  { %1136 = vmatpush2.bf16.msra.mxu1 %v1824_v33  ;;  %1094 = vmatprep.subr.bf16.mxu0 %v1829_v34 }
  0x82   :  { %1137 = vmatprep.subr.bf16.mxu1 %v1832_v35 }
  0x84   :  { %1095 = vmatpush2.bf16.msra.mxu0 %v1827_v36 }
  0x85   :  { %1138 = vmatpush2.bf16.msra.mxu1 %v1830_v37  ;;  %1096 = vmatprep.subr.bf16.mxu0 %v1835_v38 }
  0x86   :  { %1139 = vmatprep.subr.bf16.mxu1 %v1838_v39 }
  0x88   :  { %1097 = vmatpush2.bf16.msra.mxu0 %v1833_v42 }
  0x89   :  { %1140 = vmatpush2.bf16.msra.mxu1 %v1836_v43  ;;  %1098 = vmatprep.subr.bf16.mxu0 %v1841_v44 }
  0x8a   :  { %1141 = vmatprep.subr.bf16.mxu1 %v1844_v45 }
  0x8c   :  { %1099 = vmatpush2.bf16.msra.mxu0 %v1839_v49  ;;  %v1861_v49 = vld [vmem:[%s2101_s5 + $0x18] sm:$0xff]  }
  0x8d   :  { %1142 = vmatpush2.bf16.msra.mxu1 %v1842_v50  ;;  %1593 = vmatprep.subr.bf16.mxu0 %v1845_v18  ;;  %v1862_v50 = vld [vmem:[%s2101_s5 + $0x10] sm:$0xff]  }
  0x8e   :  { %1620 = vmatprep.subr.bf16.mxu1 %v1913_v1 }
  0x8f   :  { %1101 = vmatmul.mubr.bf16.vlgmr.msra.gmra.mxu0 %v328_v16  ;;  %v1863_v16 = vld [vmem:[%s2101_s5 + $0x8] sm:$0xff]  }
  0x90   :  { %1144 = vmatmul.mubr.bf16.vlgmr.msra.gmra.mxu1 %v329_v17  ;;  %1594 = vmatpush3.bf16.msra.mxu0 %v1846_v54  ;;  %v1864_v17 = vld [vmem:[%s2101_s5] sm:$0xff]  }
  0x91   :  { %1595 = vmatprep.subr.bf16.mxu0 %v1847_v19  ;;  %1621 = vmatpush3.bf16.msra.mxu1 %v1861_v49 }
  0x92   :  { %1622 = vmatprep.subr.bf16.mxu1 %v1913_v1  ;;  %1628 = vmatprep.mubr.msk.bf16.mxu1 %vm1914_vm0, %v1913_v1 }
  0x94   :  { %1596 = vmatpush3.bf16.msra.mxu0 %v1848_v51  ;;  %v1570_v51 = vld [vmem:[%s2100_s4] ss:$0 sm:$0xff] }
  0x95   :  { %1597 = vmatprep.subr.bf16.mxu0 %v1849_v52  ;;  %1623 = vmatpush3.bf16.msra.mxu1 %v1862_v50 }
  0x96   :  { %1624 = vmatprep.subr.bf16.mxu1 %v1913_v1 }
  0x98   :  { %1598 = vmatpush3.bf16.msra.mxu0 %v1850_v53 }
  0x99   :  { %1599 = vmatprep.subr.bf16.mxu0 %v1851_v55  ;;  %1625 = vmatpush3.bf16.msra.mxu1 %v1863_v16 }
  0x9a   :  { %1626 = vmatprep.subr.bf16.mxu1 %v1913_v1 }
  0x9c   :  { %1600 = vmatpush3.bf16.msra.mxu0 %v1852_v56 }
  0x9d   :  { %1601 = vmatprep.subr.bf16.mxu0 %v1853_v57  ;;  %1627 = vmatpush3.bf16.msra.mxu1 %v1864_v17 }
  0xa0   :  { %1602 = vmatpush3.bf16.msra.mxu0 %v1854_v58 }
  0xa1   :  { %1603 = vmatprep.subr.bf16.mxu0 %v1855_v59 }
  0xa4   :  { %1604 = vmatpush3.bf16.msra.mxu0 %v1856_v60 }
  0xa5   :  { %1605 = vmatprep.subr.bf16.mxu0 %v1857_v61  ;;  %v1587_v61 = vld [vmem:[%s2102_s6] ss:$0 sm:$0xff] }
  0xa8   :  { %1606 = vmatpush3.bf16.msra.mxu0 %v1858_v62 }
  0xa9   :  { %1607 = vmatprep.subr.bf16.mxu0 %v1859_v63 }
  0xac   :  { %1608 = vmatpush3.bf16.msra.mxu0 %v1860_v0 }
 0x10f   :  { %v1016_v2 = vpop.f32.mrf.mxu0 }
 0x110   :  { %v1059_v3 = vpop.f32.mrf.mxu1  ;;  %v1017_v14 = vadd.f32 %v1016_v2, %v183_v10 }
 0x111   :  { %v1018_v7 = vpop.f32.mrf.mxu0 }
 0x112   :  { %v1061_v8 = vpop.f32.mrf.mxu1  ;;  %v1019_v13 = vadd.f32 %v1018_v7, %v187_v9  ;;  %v1060_v26 = vadd.f32 %v1059_v3, %v1017_v14 }
 0x113   :  { %v1020_v11 = vpop.f32.mrf.mxu0 }
 0x114   :  { %v1063_v12 = vpop.f32.mrf.mxu1  ;;  %v1021_v21 = vadd.f32 %v1020_v11, %v183_v10  ;;  %v1062_v24 = vadd.f32 %v1061_v8, %v1019_v13 }
 0x115   :  { %v1022_v15 = vpop.f32.mrf.mxu0 }
 0x116   :  { %v1065_v20 = vpop.f32.mrf.mxu1  ;;  %v1023_v25 = vadd.f32 %v1022_v15, %v187_v9  ;;  %v1064_v29 = vadd.f32 %v1063_v12, %v1021_v21 }
 0x118   :  { %v1066_v33 = vadd.f32 %v1065_v20, %v1023_v25 }
 0x14f   :  { %v1102_v22 = vpop.f32.mrf.mxu0 }
 0x150   :  { %v1145_v23 = vpop.f32.mrf.mxu1  ;;  %v1103_v30 = vadd.f32 %v1102_v22, %v1060_v26 }
 0x151   :  { %v1104_v27 = vpop.f32.mrf.mxu0 }
 0x152   :  { %v1147_v28 = vpop.f32.mrf.mxu1  ;;  %v1105_v47 = vadd.f32 %v1104_v27, %v1062_v24  ;;  %v1146_v39 = vadd.f32 %v1145_v23, %v1103_v30 }
 0x153   :  { %v1106_v31 = vpop.f32.mrf.mxu0 }
 0x154   :  { %v1149_v32 = vpop.f32.mrf.mxu1  ;;  %v1107_v34 = vadd.f32 %v1106_v31, %v1064_v29  ;;  %v1148_v36 = vadd.f32 %v1147_v28, %v1105_v47  ;;  %v1154_v45 = vmax.f32 %v1146_v39, 0.0 }
 0x155   :  { %v1108_v35 = vpop.f32.mrf.mxu0 }
 0x156   :  { %v1150_v37 = vadd.f32 %v1149_v32, %v1107_v34  ;;  %v1109_v38 = vadd.f32 %v1108_v35, %v1066_v33  ;;  %v1151_v40 = vpop.f32.mrf.mxu1  ;;  %v1155_v43 = vmax.f32 %v1148_v36, 0.0 }
 0x158   :  { %v1152_v41 = vadd.f32 %v1151_v40, %v1109_v38  ;;  %v1156_v42 = vmax.f32 %v1150_v37, 0.0 }
 0x15a   :  { %v1157_v44 = vmax.f32 %v1152_v41, 0.0  ;;  %v1158_v48 = vpack.c.bf16 %v1156_v42, %v1154_v45 }
 0x15c   :  { %v1159_v46 = vpack.c.bf16 %v1157_v44, %v1155_v43 }
 0x15e   :  { %1327 = vmatprep.mubr.bf16.mxu0 %v1159_v46 }
 0x15f   :  { %1328 = vmatmul.mubr.bf16.vlgmr.msra.gmra.mxu0 %v1158_v48 }
 0x21f   :  { %v1609_v18 = vpop.f32.mrf.mxu0 }
 0x221   :  { %v1610_v54 = vpop.f32.mrf.mxu0 }
 0x222   :  { %v1611_v19 = vadd.f32 %v1610_v54, %v1609_v18 }
 0x223   :  { %v1612_v52 = vpop.f32.mrf.mxu0 }
 0x224   :  { %v1330_v55 = vadd.f32 %v1611_v19, %v1570_v51 }
 0x225   :  { %v1613_v53 = vpop.f32.mrf.mxu0 }
 0x226   :  { %v1614_v56 = vadd.f32 %v1613_v53, %v1612_v52  ;;  %v1336_v58 = vmax.f32 %v1330_v55, 0.0 }
 0x228   :  { %v1333_v57 = vadd.f32 %v1614_v56, %v1570_v51 }
 0x22a   :  { %v1337_v59 = vmax.f32 %v1333_v57, 0.0 }
 0x22c   :  { %v1338_v60 = vpack.c.bf16 %v1337_v59, %v1336_v58 }
 0x22e   :  { %1629 = vmatmul.mubr.msk.bf16.vlgmr.msra.gmra.mxu1 %vm1378_vm1, %v1338_v60 }
 0x2ee   :  { %v1416_v62 = vpop.f32.mrf.mxu1 }
 0x2ef   :  { %v1417_v63 = vadd.f32 %v1587_v61, %v1416_v62 }
 0x2f0   :  { %v1630_v0 = vpop.f32.mrf.mxu1 }
 0x2f1   :  { %1423 = vst [vmem:[#allocation5] sm:$0xff] %v1417_v63 }
 0x2f2   :  { %v1419_v1 = vpop.f32.mrf.mxu1 }
 0x2f3   :  { %v1420_v2 = vadd.f32 %v1587_v61, %v1419_v1 }
 0x2f4   :  { %v1631_v3 = vpop.f32.mrf.mxu1 }
 0x2f5   :  { %1424 = vst [vmem:[#allocation5 + $0x8] sm:$0xff] %v1420_v2 }
 0x2f6   :  { %1429 = vsyncadd [#allocation4], 224  ;;  %s1915_s4 = smov [#allocation5]  }
 0x2f7   :  { %s1430_s16 = sshll.u32 %s1915_s4, 4  ;;  %s1431_s16 = int_to_ptr.vmem [resolvable:$true] %s1430_s16 }
 0x2f8   :  { %s1885_s17 = scalar_lea.vmem %s1431_s16, 32  ;;  %s1889_s18 = scalar_lea.vmem %s1431_s16, 256 }
 0x2f9   :  { %p1886_p5 = scmp.ne.s32.totalorder %s1431_s16, %s1885_s17  ;;  %p1890_p6 = scmp.lt.s32.totalorder %s1431_s16, %s1431_s16 }
 0x2fa   :  { %p1891_p7 = scmp.lt.s32.totalorder %s1889_s18, %s1885_s17 }
 0x2fc   :  { %p1892_p8 = por %p1891_p7, %p1890_p6 }
 0x2fe   :  { %p1893_p9 = pnand %p1892_p8, %p1886_p5 }
 0x300   :  { %1896 = shalt.err (!%p1893_p9)
}
 0x301   :  { %s1916_s6 = smov 32   ;;  %s1917_s19 = smov 2  }
 0x302   :  { %1436 = dma.vmem_to_hbm [thread:$0]  %s1431_s16, 32, %s2103_s7, [#allocation4], %s1916_s6, %s1916_s6, %s1917_s19  }
 0x303   :  { %1907 = dma.done.wait [#allocation4], 256  }
 0x304   :  { %1908 = vsyncadd [#allocation4], 4294967040 }
 0x305   :  { %1440 = vsyncpa [#allocation3], 1 }
 0x306   :  { %1441 = vsyncpa [#allocation4], 1 }

</bundles_post_ra>
